<compile_context>
chip_gen: v7x
topology: tpu7x:2x2x1
jax: 0.10.0
libtpu: 0.0.40
codegen_flags: <defaults>
</compile_context>

<pallas_src>
import functools

import jax
import jax.numpy as jnp
from jax import lax
from jax.experimental import pallas as pl
from jax.experimental.pallas import tpu as pltpu

# ---- hyperparameters (stand-ins for the global `args` in the PyTorch code) ----
HIDDEN_LAYER_SIZE = 32      # args.HIDDEN_LAYER_SIZE
WINDOWS_NUM = 4             # args.WINDOWS_NUM
GAUSSIAN_MIX_NUM = 4        # args.GAUSSIAN_MIX_NUM
BATCH_SIZE = 2              # args.BATCH_SIZE
IN_CHANNELS = 3             # (dx, dy, pen)
ENCODE_DIM = 16
SEQ_LEN = 8                 # T (stroke sequence length)
ENC_LEN = 10                # U (character sequence length)
WINDOWS_OUT_CHANNELS = 3 * WINDOWS_NUM            # alpha, beta, kappa
OUT_CHANNELS = 6 * GAUSSIAN_MIX_NUM + 1           # m1,m2,log_s1,log_s2,rho,pi,e
LANES = 128                                       # lane-dense packing width
IN_PAD = 8                                        # input channels padded to 8


# ---------------------- packed-weight slab layout ----------------------------
def _slab_offsets(H, E, DP):
    """Sublane offset of each weight/bias block inside the packed (rows,128) slab."""
    layout = [("wih1", DP), ("whh1", H), ("b1", 8),
              ("wih2h", H), ("wih2e", E), ("wih2x", DP), ("whh2", H), ("b2", 8),
              ("ww", H), ("bw", 8), ("wm", H), ("bm", 8)]
    off, o = {}, 0
    for name, rows in layout:
        off[name] = o
        o += rows
    off["_total"] = o
    return off


def _pad_block(w, rows, cols=LANES):
    r, c = w.shape
    return jnp.pad(w, ((0, rows - r), (0, cols - c)))


def _pack_weight_slab(params, encode_dim):
    """Pack all 12 weight/bias tensors into one lane-dense f32 slab (1 DMA)."""
    H, E, DP = HIDDEN_LAYER_SIZE, encode_dim, IN_PAD
    w_ih2 = params["w_ih2"]                 # rows: [H (out0) | E (window) | Din (ins)]
    blocks = [
        _pad_block(params["w_ih1"], DP), _pad_block(params["w_hh1"], H),
        _pad_block(params["b1"], 8),
        _pad_block(w_ih2[:H], H), _pad_block(w_ih2[H:H + E], E),
        _pad_block(w_ih2[H + E:], DP), _pad_block(params["w_hh2"], H),
        _pad_block(params["b2"], 8),
        _pad_block(params["ww"], H), _pad_block(params["bw"], 8),
        _pad_block(params["wm"], H), _pad_block(params["bm"], 8),
    ]
    slab = jnp.concatenate(blocks, axis=0)
    assert slab.shape == (_slab_offsets(H, E, DP)["_total"], LANES)
    return slab


# ============================ fused forward kernel ===========================
def _congen_fused_kernel(ins_ref, enc_ref, w_ref, st0_ref,      # inputs
                         y_ref, misc_ref,                       # outputs
                         out0_s, out1_s,                        # VMEM scratch
                         *, B, T, U, E, H, K, G, DP):
    f32 = jnp.float32
    off = _slab_offsets(H, E, DP)

    def wblk(name, rows):                    # static sublane slice of the slab
        o = off[name]
        return w_ref[o:o + rows, :]

    wih1, whh1, b1 = wblk("wih1", DP), wblk("whh1", H), wblk("b1", 1)
    wih2h, wih2e, wih2x = wblk("wih2h", H), wblk("wih2e", E), wblk("wih2x", DP)
    whh2, b2 = wblk("whh2", H), wblk("b2", 1)
    ww, bw = wblk("ww", H), wblk("bw", 1)
    wm, bm = wblk("wm", H), wblk("bm", 1)

    misc_ref[...] = jnp.zeros_like(misc_ref)     # deterministic unused lanes
    ins = ins_ref[...]                           # (T*B, DP) time-major rows

    # ---------------- LSTM 1 (input projection hoisted out of recurrence) ----
    gx1 = jnp.dot(ins, wih1, preferred_element_type=f32) + b1       # (T*B, 4H)
    h1 = st0_ref[:, 0:H]
    c1 = st0_ref[:, H:2 * H]
    for t in range(T):                           # static unroll, T is small
        gates = gx1[t * B:(t + 1) * B, :] + jnp.dot(h1, whh1,
                                                    preferred_element_type=f32)
        sg = jax.nn.sigmoid(gates)               # full 128-lane EUP pass
        tg = jnp.tanh(gates)
        c1 = sg[:, H:2 * H] * c1 + sg[:, 0:H] * tg[:, 2 * H:3 * H]
        h1 = sg[:, 3 * H:4 * H] * jnp.tanh(c1)
        out0_s[t * B:(t + 1) * B, :] = h1        # per-step store, no concat
    misc_ref[:, 0:H] = h1                        # LSTM1 final state (issued early)
    misc_ref[:, H:2 * H] = c1

    # ---------------- attention window (vectorized over batch & time) --------
    out0 = out0_s[...]                                            # (T*B, H)
    ow = jnp.dot(out0, ww, preferred_element_type=f32) + bw       # (T*B, 128)
    e = jnp.exp(ow[:, 0:3 * K])
    alpha, beta, kappa = e[:, 0:K], e[:, K:2 * K], e[:, 2 * K:3 * K]
    acc = jnp.zeros((B, K), f32)                 # running kappa cumsum (self.K)
    fk = []
    for t in range(T):
        acc = acc + kappa[t * B:(t + 1) * B, :]
        fk.append(acc)
    full_K = jnp.concatenate(fk, axis=0)                          # (T*B, K)
    u_row = lax.broadcasted_iota(jnp.int32, (1, U), 1).astype(f32)
    w = jnp.zeros((T * B, U), f32)
    for k in range(K):                           # K is small, static unroll
        diff = full_K[:, k:k + 1] - u_row
        w = w + alpha[:, k:k + 1] * jnp.exp(-beta[:, k:k + 1] * diff * diff)

    # window_output folded into the LSTM2 input projection: mask w per batch
    # (narrow (T*B,U) selects), reduce to one (T*B,E) wout, ONE wout@W matmul.
    rowm = lax.broadcasted_iota(jnp.int32, (T * B, U), 0)
    rowm = (rowm & (B - 1)) if (B & (B - 1)) == 0 else rowm % B
    wout = jnp.zeros((T * B, E), f32)
    for b in range(B):
        w_b = jnp.where(rowm == b, w, 0.0)
        wout = wout + jnp.dot(w_b, enc_ref[b * U:(b + 1) * U, :],
                              preferred_element_type=f32)

    # LSTM2 input projection: the [out0, wout, ins] concat folded into three
    # back-to-back chained dots (MRB/MRF-friendly accumulation).
    gx2 = (jnp.dot(out0, wih2h, preferred_element_type=f32)
           + jnp.dot(wout, wih2e, preferred_element_type=f32)
           + jnp.dot(ins, wih2x, preferred_element_type=f32)
           + b2)                                                  # (T*B, 4H)

    # ---------------- LSTM 2 --------------------------------------------------
    h2 = st0_ref[:, 2 * H:3 * H]
    c2 = st0_ref[:, 3 * H:4 * H]
    for t in range(T):
        gates = gx2[t * B:(t + 1) * B, :] + jnp.dot(h2, whh2,
                                                    preferred_element_type=f32)
        sg = jax.nn.sigmoid(gates)
        tg = jnp.tanh(gates)
        c2 = sg[:, H:2 * H] * c2 + sg[:, 0:H] * tg[:, 2 * H:3 * H]
        h2 = sg[:, 3 * H:4 * H] * jnp.tanh(c2)
        out1_s[t * B:(t + 1) * B, :] = h2
    misc_ref[:, 2 * H:3 * H] = h2                # LSTM2 final state
    misc_ref[:, 3 * H:4 * H] = c2
    misc_ref[:, 4 * H:4 * H + K] = acc           # kappa carry (the would-be self.K)

    # ---------------- MDN head (lane-dense (T*B,128) store) ------------------
    y = jnp.dot(out1_s[...], wm, preferred_element_type=f32) + bm
    col = lax.broadcasted_iota(jnp.int32, y.shape, 1)
    is_rho = jnp.logical_and(col >= 4 * G, col < 5 * G)
    y_ref[...] = jnp.where(is_rho, jnp.tanh(y), y)


# ============================= model wrapper =================================
def init_params(key, in_channels, encode_dim):
    H = HIDDEN_LAYER_SIZE
    d2 = in_channels + H + encode_dim
    ks = jax.random.split(key, 8)
    s = 0.1
    return {
        "w_ih1": s * jax.random.normal(ks[0], (in_channels, 4 * H), jnp.float32),
        "w_hh1": s * jax.random.normal(ks[1], (H, 4 * H), jnp.float32),
        "b1": jnp.zeros((1, 4 * H), jnp.float32),
        "w_ih2": s * jax.random.normal(ks[2], (d2, 4 * H), jnp.float32),
        "w_hh2": s * jax.random.normal(ks[3], (H, 4 * H), jnp.float32),
        "b2": jnp.zeros((1, 4 * H), jnp.float32),
        "ww": s * jax.random.normal(ks[4], (H, WINDOWS_OUT_CHANNELS), jnp.float32),
        "bw": s * jax.random.normal(ks[5], (1, WINDOWS_OUT_CHANNELS), jnp.float32),
        "wm": s * jax.random.normal(ks[6], (H, OUT_CHANNELS), jnp.float32),
        "bm": s * jax.random.normal(ks[7], (1, OUT_CHANNELS), jnp.float32),
    }


def state_values_inits(batch):
    z = jnp.zeros((1, batch, HIDDEN_LAYER_SIZE), jnp.float32)
    return ((z, z), (z, z))


def con_gen_forward(params, ins, encoded, states_value_hidden):
    # TODO(synk): only the K_cumsum == 0 branch of the PyTorch forward is
    # implemented (the stateful kappa carry-over input path is not wired in);
    # the would-be `self.K = full_K[:, -1]` is returned as the 4th output.
    (h0_0, c0_0), (h0_1, c0_1) = states_value_hidden
    B, T, Din = ins.shape
    U, E = encoded.shape[1], encoded.shape[2]
    H = HIDDEN_LAYER_SIZE
    K = WINDOWS_NUM
    G = GAUSSIAN_MIX_NUM
    O = OUT_CHANNELS
    DP = IN_PAD

    # time-major flat rows (row = t*B + b), channels zero-padded to 8 lanes.
    ins_tm = jnp.transpose(ins, (1, 0, 2)).reshape(T * B, Din)
    ins_pad = jnp.pad(ins_tm, ((0, 0), (0, DP - Din)))
    enc_flat = encoded.reshape(B * U, E)
    # all weights/biases in ONE lane-dense slab; all initial states in one slab.
    w_slab = _pack_weight_slab(params, E)
    st0 = jnp.concatenate([h0_0[0], c0_0[0], h0_1[0], c0_1[0]], axis=-1)  # (B,4H)

    kernel = functools.partial(_congen_fused_kernel,
                               B=B, T=T, U=U, E=E, H=H, K=K, G=G, DP=DP)

    # Whole-array VMEM blocks, no grid: single-shot kernel, no pipeline overhead.
    y_tm, misc = pl.pallas_call(
        kernel,
        out_shape=(jax.ShapeDtypeStruct((T * B, LANES), jnp.float32),
                   jax.ShapeDtypeStruct((B, 2 * LANES), jnp.float32)),
        scratch_shapes=[pltpu.VMEM((T * B, H), jnp.float32),   # out0 (LSTM1 h's)
                        pltpu.VMEM((T * B, H), jnp.float32)],  # out1 (LSTM2 h's)
    )(ins_pad, enc_flat, w_slab, st0)

    # reorder time-major kernel rows back to PyTorch's batch-major flattening.
    y = jnp.transpose(y_tm.reshape(T, B, LANES), (1, 0, 2)).reshape(B * T, LANES)[:, :O]
    mix_dens_net_dict = {
        "m1": y[:, 0:G], "m2": y[:, G:2 * G],
        "log_s1": y[:, 2 * G:3 * G], "log_s2": y[:, 3 * G:4 * G],
        "rho": y[:, 4 * G:5 * G], "pred_pi": y[:, 5 * G:6 * G],
    }
    pred_e = y[:, 6 * G:]
    hT0, cT0 = misc[:, 0:H], misc[:, H:2 * H]
    hT1, cT1 = misc[:, 2 * H:3 * H], misc[:, 3 * H:4 * H]
    k_last = misc[:, 4 * H:4 * H + K]
    states_value_hid = ((hT0[None], cT0[None]), (hT1[None], cT1[None]))
    return states_value_hid, mix_dens_net_dict, pred_e, k_last


# ========================= pure-JAX reference (check) ========================
def _lstm_ref(x, w_ih, w_hh, b, h0, c0):
    def step(carry, xt):
        h, c = carry
        gates = (jnp.dot(xt, w_ih, precision="highest")
                 + jnp.dot(h, w_hh, precision="highest") + b[0])
        i_g, f_g, g_g, o_g = jnp.split(gates, 4, axis=-1)
        c = jax.nn.sigmoid(f_g) * c + jax.nn.sigmoid(i_g) * jnp.tanh(g_g)
        h = jax.nn.sigmoid(o_g) * jnp.tanh(c)
        return (h, c), h
    (hT, cT), out = lax.scan(step, (h0, c0), jnp.transpose(x, (1, 0, 2)))
    return jnp.transpose(out, (1, 0, 2)), hT, cT


def _ref_forward(params, ins, encoded, states):
    (h0_0, c0_0), (h0_1, c0_1) = states
    out0, hT0, cT0 = _lstm_ref(ins, params["w_ih1"], params["w_hh1"],
                               params["b1"], h0_0[0], c0_0[0])
    ow = jnp.einsum("bth,hk->btk", out0, params["ww"],
                    precision="highest") + params["bw"][0]
    e = jnp.exp(ow)[..., None]
    alpha, beta, kappa = jnp.split(e, 3, axis=-2)
    full_K = jnp.cumsum(kappa, axis=1)
    u = jnp.arange(encoded.shape[1], dtype=jnp.float32).reshape(1, 1, 1, -1)
    w = jnp.sum(jnp.exp(-beta * (full_K - u) ** 2) * alpha, axis=-2)
    wout = jnp.einsum("btu,bue->bte", w, encoded, precision="highest")
    x2 = jnp.concatenate([out0, wout, ins], axis=-1)
    out1, hT1, cT1 = _lstm_ref(x2, params["w_ih2"], params["w_hh2"],
                               params["b2"], h0_1[0], c0_1[0])
    flat = out1.reshape(-1, out1.shape[-1])
    y = jnp.dot(flat, params["wm"], precision="highest") + params["bm"][0]
    G = GAUSSIAN_MIX_NUM
    y = y.at[:, 4 * G:5 * G].set(jnp.tanh(y[:, 4 * G:5 * G]))
    return y, (hT0, cT0, hT1, cT1), full_K[:, -1, :, 0]


# =================================== main ====================================
if __name__ == "__main__":
    key = jax.random.PRNGKey(0)
    kp, ki, ke = jax.random.split(key, 3)
    params = init_params(kp, IN_CHANNELS, ENCODE_DIM)
    ins = jax.random.normal(ki, (BATCH_SIZE, SEQ_LEN, IN_CHANNELS), jnp.float32)
    encoded = jax.random.normal(ke, (BATCH_SIZE, ENC_LEN, ENCODE_DIM), jnp.float32)
    states = state_values_inits(BATCH_SIZE)

    fwd = jax.jit(con_gen_forward)
    out = fwd(params, ins, encoded, states)
    jax.block_until_ready(out)
    states_out, mdn_dict, pred_e, k_last = out

    # correctness check vs. a pure-JAX reference.  Tolerance 1e-3 (tightened
    # from 1e-2/5e-2): loose enough for TPU matmul-precision noise, tight
    # enough that any gate-slice / layout / packing bug is caught.
    y_ref, (hT0_r, cT0_r, hT1_r, cT1_r), k_ref = _ref_forward(
        params, ins, encoded, states)
    y_kernel = jnp.concatenate(
        [mdn_dict["m1"], mdn_dict["m2"], mdn_dict["log_s1"], mdn_dict["log_s2"],
         mdn_dict["rho"], mdn_dict["pred_pi"], pred_e], axis=1)
    assert y_kernel.shape == (BATCH_SIZE * SEQ_LEN, OUT_CHANNELS)
    tol = dict(atol=1e-3, rtol=1e-3)
    assert bool(jnp.allclose(y_kernel, y_ref, **tol)), "MDN output mismatch"
    assert bool(jnp.allclose(states_out[0][0][0], hT0_r, **tol)), "LSTM1 h mismatch"
    assert bool(jnp.allclose(states_out[0][1][0], cT0_r, **tol)), "LSTM1 c mismatch"
    assert bool(jnp.allclose(states_out[1][0][0], hT1_r, **tol)), "LSTM2 h mismatch"
    assert bool(jnp.allclose(states_out[1][1][0], cT1_r, **tol)), "LSTM2 c mismatch"
    assert bool(jnp.allclose(k_last, k_ref, **tol)), "kappa carry mismatch"

    print("KERNEL_OK")
</pallas_src>

<mosaic_0001>
module attributes {stable_mosaic.version = 11 : i64} {
  func.func @_congen_fused_kernel(%arg0: memref<16x8xf32, #tpu.memory_space<vmem>>, %arg1: memref<20x16xf32, #tpu.memory_space<vmem>>, %arg2: memref<224x128xf32, #tpu.memory_space<vmem>>, %arg3: memref<2x128xf32, #tpu.memory_space<vmem>>, %arg4: memref<16x128xf32, #tpu.memory_space<vmem>>, %arg5: memref<2x256xf32, #tpu.memory_space<vmem>>, %arg6: memref<16x32xf32, #tpu.memory_space<vmem>>, %arg7: memref<16x32xf32, #tpu.memory_space<vmem>>) attributes {dimension_semantics = [], scalar_prefetch = 0 : i64, scratch_operands = 2 : i64, tpu.core_type = #tpu.core_type<tc>} {
    %c0 = arith.constant 0 : index
    %c0_0 = arith.constant 0 : index
    %0 = vector.load %arg2[%c0, %c0_0] : memref<224x128xf32, #tpu.memory_space<vmem>>, vector<8x128xf32>
    %c8 = arith.constant 8 : index
    %c0_1 = arith.constant 0 : index
    %1 = vector.load %arg2[%c8, %c0_1] : memref<224x128xf32, #tpu.memory_space<vmem>>, vector<32x128xf32>
    %c40 = arith.constant 40 : index
    %c0_2 = arith.constant 0 : index
    %2 = vector.load %arg2[%c40, %c0_2] : memref<224x128xf32, #tpu.memory_space<vmem>>, vector<1x128xf32>
    %c48 = arith.constant 48 : index
    %c0_3 = arith.constant 0 : index
    %3 = vector.load %arg2[%c48, %c0_3] : memref<224x128xf32, #tpu.memory_space<vmem>>, vector<32x128xf32>
    %c80 = arith.constant 80 : index
    %c0_4 = arith.constant 0 : index
    %4 = vector.load %arg2[%c80, %c0_4] : memref<224x128xf32, #tpu.memory_space<vmem>>, vector<16x128xf32>
    %c96 = arith.constant 96 : index
    %c0_5 = arith.constant 0 : index
    %5 = vector.load %arg2[%c96, %c0_5] : memref<224x128xf32, #tpu.memory_space<vmem>>, vector<8x128xf32>
    %c104 = arith.constant 104 : index
    %c0_6 = arith.constant 0 : index
    %6 = vector.load %arg2[%c104, %c0_6] : memref<224x128xf32, #tpu.memory_space<vmem>>, vector<32x128xf32>
    %c136 = arith.constant 136 : index
    %c0_7 = arith.constant 0 : index
    %7 = vector.load %arg2[%c136, %c0_7] : memref<224x128xf32, #tpu.memory_space<vmem>>, vector<1x128xf32>
    %c144 = arith.constant 144 : index
    %c0_8 = arith.constant 0 : index
    %8 = vector.load %arg2[%c144, %c0_8] : memref<224x128xf32, #tpu.memory_space<vmem>>, vector<32x128xf32>
    %c176 = arith.constant 176 : index
    %c0_9 = arith.constant 0 : index
    %9 = vector.load %arg2[%c176, %c0_9] : memref<224x128xf32, #tpu.memory_space<vmem>>, vector<1x128xf32>
    %c184 = arith.constant 184 : index
    %c0_10 = arith.constant 0 : index
    %10 = vector.load %arg2[%c184, %c0_10] : memref<224x128xf32, #tpu.memory_space<vmem>>, vector<32x128xf32>
    %c216 = arith.constant 216 : index
    %c0_11 = arith.constant 0 : index
    %11 = vector.load %arg2[%c216, %c0_11] : memref<224x128xf32, #tpu.memory_space<vmem>>, vector<1x128xf32>
    %cst = arith.constant 0.000000e+00 : f32
    %12 = vector.broadcast %cst : f32 to vector<2x256xf32>
    %c0_12 = arith.constant 0 : index
    %c0_13 = arith.constant 0 : index
    %13 = vector.load %arg5[%c0_12, %c0_13] : memref<2x256xf32, #tpu.memory_space<vmem>>, vector<2x256xf32>
    tpu.vector_store %arg5[%c0_12, %c0_13], %12 {strides = array<i32>} : memref<2x256xf32, #tpu.memory_space<vmem>>, vector<2x256xf32>,
    %c0_14 = arith.constant 0 : index
    %c0_15 = arith.constant 0 : index
    %14 = vector.load %arg0[%c0_14, %c0_15] : memref<16x8xf32, #tpu.memory_space<vmem>>, vector<16x8xf32>
    %cst_16 = arith.constant dense<0.000000e+00> : vector<16x128xf32>
    %15 = tpu.matmul %14, %0, %cst_16 {dimension_numbers = #tpu.dot_dimension_numbers<[1], [0], [0], [1], [0, 0, 1, 1], [], []>} : vector<16x8xf32>, vector<8x128xf32>, vector<16x128xf32> -> vector<16x128xf32>
    %16 = vector.broadcast %2 : vector<1x128xf32> to vector<16x128xf32>
    %17 = arith.addf %15, %16 : vector<16x128xf32>
    %c0_17 = arith.constant 0 : index
    %c0_18 = arith.constant 0 : index
    %18 = vector.load %arg3[%c0_17, %c0_18] : memref<2x128xf32, #tpu.memory_space<vmem>>, vector<2x32xf32>
    %c0_19 = arith.constant 0 : index
    %c32 = arith.constant 32 : index
    %19 = vector.load %arg3[%c0_19, %c32] : memref<2x128xf32, #tpu.memory_space<vmem>>, vector<2x32xf32>
    %20 = vector.extract_strided_slice %17 {offsets = [0, 0], sizes = [2, 128], strides = [1, 1]} : vector<16x128xf32> to vector<2x128xf32>
    %cst_20 = arith.constant dense<0.000000e+00> : vector<2x128xf32>
    %21 = tpu.matmul %18, %1, %cst_20 {dimension_numbers = #tpu.dot_dimension_numbers<[1], [0], [0], [1], [0, 0, 1, 1], [], []>} : vector<2x32xf32>, vector<32x128xf32>, vector<2x128xf32> -> vector<2x128xf32>
    %22 = arith.addf %20, %21 : vector<2x128xf32>
    %23 = arith.negf %22 : vector<2x128xf32>
    %24 = math.exp %23 : vector<2x128xf32>
    %cst_21 = arith.constant 1.000000e+00 : f32
    %25 = vector.broadcast %cst_21 : f32 to vector<2x128xf32>
    %26 = arith.addf %25, %24 : vector<2x128xf32>
    %27 = arith.divf %25, %26 : vector<2x128xf32>
    %28 = math.tanh %22 : vector<2x128xf32>
    %29 = vector.extract_strided_slice %27 {offsets = [0, 32], sizes = [2, 32], strides = [1, 1]} : vector<2x128xf32> to vector<2x32xf32>
    %30 = arith.mulf %29, %19 : vector<2x32xf32>
    %31 = vector.extract_strided_slice %27 {offsets = [0, 0], sizes = [2, 32], strides = [1, 1]} : vector<2x128xf32> to vector<2x32xf32>
    %32 = vector.extract_strided_slice %28 {offsets = [0, 64], sizes = [2, 32], strides = [1, 1]} : vector<2x128xf32> to vector<2x32xf32>
    %33 = arith.mulf %31, %32 : vector<2x32xf32>
    %34 = arith.addf %30, %33 : vector<2x32xf32>
    %35 = vector.extract_strided_slice %27 {offsets = [0, 96], sizes = [2, 32], strides = [1, 1]} : vector<2x128xf32> to vector<2x32xf32>
    %36 = math.tanh %34 : vector<2x32xf32>
    %37 = arith.mulf %35, %36 : vector<2x32xf32>
    %c0_22 = arith.constant 0 : index
    %c0_23 = arith.constant 0 : index
    %38 = vector.load %arg6[%c0_22, %c0_23] : memref<16x32xf32, #tpu.memory_space<vmem>>, vector<2x32xf32>
    tpu.vector_store %arg6[%c0_22, %c0_23], %37 {strides = array<i32>} : memref<16x32xf32, #tpu.memory_space<vmem>>, vector<2x32xf32>,
    %39 = vector.extract_strided_slice %17 {offsets = [2, 0], sizes = [2, 128], strides = [1, 1]} : vector<16x128xf32> to vector<2x128xf32>
    %cst_24 = arith.constant dense<0.000000e+00> : vector<2x128xf32>
    %40 = tpu.matmul %37, %1, %cst_24 {dimension_numbers = #tpu.dot_dimension_numbers<[1], [0], [0], [1], [0, 0, 1, 1], [], []>} : vector<2x32xf32>, vector<32x128xf32>, vector<2x128xf32> -> vector<2x128xf32>
    %41 = arith.addf %39, %40 : vector<2x128xf32>
    %42 = arith.negf %41 : vector<2x128xf32>
    %43 = math.exp %42 : vector<2x128xf32>
    %cst_25 = arith.constant 1.000000e+00 : f32
    %44 = vector.broadcast %cst_25 : f32 to vector<2x128xf32>
    %45 = arith.addf %44, %43 : vector<2x128xf32>
    %46 = arith.divf %44, %45 : vector<2x128xf32>
    %47 = math.tanh %41 : vector<2x128xf32>
    %48 = vector.extract_strided_slice %46 {offsets = [0, 32], sizes = [2, 32], strides = [1, 1]} : vector<2x128xf32> to vector<2x32xf32>
    %49 = arith.mulf %48, %34 : vector<2x32xf32>
    %50 = vector.extract_strided_slice %46 {offsets = [0, 0], sizes = [2, 32], strides = [1, 1]} : vector<2x128xf32> to vector<2x32xf32>
    %51 = vector.extract_strided_slice %47 {offsets = [0, 64], sizes = [2, 32], strides = [1, 1]} : vector<2x128xf32> to vector<2x32xf32>
    %52 = arith.mulf %50, %51 : vector<2x32xf32>
    %53 = arith.addf %49, %52 : vector<2x32xf32>
    %54 = vector.extract_strided_slice %46 {offsets = [0, 96], sizes = [2, 32], strides = [1, 1]} : vector<2x128xf32> to vector<2x32xf32>
    %55 = math.tanh %53 : vector<2x32xf32>
    %56 = arith.mulf %54, %55 : vector<2x32xf32>
    %c2 = arith.constant 2 : index
    %c0_26 = arith.constant 0 : index
    %57 = vector.load %arg6[%c2, %c0_26] : memref<16x32xf32, #tpu.memory_space<vmem>>, vector<2x32xf32>
    tpu.vector_store %arg6[%c2, %c0_26], %56 {strides = array<i32>} : memref<16x32xf32, #tpu.memory_space<vmem>>, vector<2x32xf32>,
    %58 = vector.extract_strided_slice %17 {offsets = [4, 0], sizes = [2, 128], strides = [1, 1]} : vector<16x128xf32> to vector<2x128xf32>
    %cst_27 = arith.constant dense<0.000000e+00> : vector<2x128xf32>
    %59 = tpu.matmul %56, %1, %cst_27 {dimension_numbers = #tpu.dot_dimension_numbers<[1], [0], [0], [1], [0, 0, 1, 1], [], []>} : vector<2x32xf32>, vector<32x128xf32>, vector<2x128xf32> -> vector<2x128xf32>
    %60 = arith.addf %58, %59 : vector<2x128xf32>
    %61 = arith.negf %60 : vector<2x128xf32>
    %62 = math.exp %61 : vector<2x128xf32>
    %cst_28 = arith.constant 1.000000e+00 : f32
    %63 = vector.broadcast %cst_28 : f32 to vector<2x128xf32>
    %64 = arith.addf %63, %62 : vector<2x128xf32>
    %65 = arith.divf %63, %64 : vector<2x128xf32>
    %66 = math.tanh %60 : vector<2x128xf32>
    %67 = vector.extract_strided_slice %65 {offsets = [0, 32], sizes = [2, 32], strides = [1, 1]} : vector<2x128xf32> to vector<2x32xf32>
    %68 = arith.mulf %67, %53 : vector<2x32xf32>
    %69 = vector.extract_strided_slice %65 {offsets = [0, 0], sizes = [2, 32], strides = [1, 1]} : vector<2x128xf32> to vector<2x32xf32>
    %70 = vector.extract_strided_slice %66 {offsets = [0, 64], sizes = [2, 32], strides = [1, 1]} : vector<2x128xf32> to vector<2x32xf32>
    %71 = arith.mulf %69, %70 : vector<2x32xf32>
    %72 = arith.addf %68, %71 : vector<2x32xf32>
    %73 = vector.extract_strided_slice %65 {offsets = [0, 96], sizes = [2, 32], strides = [1, 1]} : vector<2x128xf32> to vector<2x32xf32>
    %74 = math.tanh %72 : vector<2x32xf32>
    %75 = arith.mulf %73, %74 : vector<2x32xf32>
    %c4 = arith.constant 4 : index
    %c0_29 = arith.constant 0 : index
    %76 = vector.load %arg6[%c4, %c0_29] : memref<16x32xf32, #tpu.memory_space<vmem>>, vector<2x32xf32>
    tpu.vector_store %arg6[%c4, %c0_29], %75 {strides = array<i32>} : memref<16x32xf32, #tpu.memory_space<vmem>>, vector<2x32xf32>,
    %77 = vector.extract_strided_slice %17 {offsets = [6, 0], sizes = [2, 128], strides = [1, 1]} : vector<16x128xf32> to vector<2x128xf32>
    %cst_30 = arith.constant dense<0.000000e+00> : vector<2x128xf32>
    %78 = tpu.matmul %75, %1, %cst_30 {dimension_numbers = #tpu.dot_dimension_numbers<[1], [0], [0], [1], [0, 0, 1, 1], [], []>} : vector<2x32xf32>, vector<32x128xf32>, vector<2x128xf32> -> vector<2x128xf32>
    %79 = arith.addf %77, %78 : vector<2x128xf32>
    %80 = arith.negf %79 : vector<2x128xf32>
    %81 = math.exp %80 : vector<2x128xf32>
    %cst_31 = arith.constant 1.000000e+00 : f32
    %82 = vector.broadcast %cst_31 : f32 to vector<2x128xf32>
    %83 = arith.addf %82, %81 : vector<2x128xf32>
    %84 = arith.divf %82, %83 : vector<2x128xf32>
    %85 = math.tanh %79 : vector<2x128xf32>
    %86 = vector.extract_strided_slice %84 {offsets = [0, 32], sizes = [2, 32], strides = [1, 1]} : vector<2x128xf32> to vector<2x32xf32>
    %87 = arith.mulf %86, %72 : vector<2x32xf32>
    %88 = vector.extract_strided_slice %84 {offsets = [0, 0], sizes = [2, 32], strides = [1, 1]} : vector<2x128xf32> to vector<2x32xf32>
    %89 = vector.extract_strided_slice %85 {offsets = [0, 64], sizes = [2, 32], strides = [1, 1]} : vector<2x128xf32> to vector<2x32xf32>
    %90 = arith.mulf %88, %89 : vector<2x32xf32>
    %91 = arith.addf %87, %90 : vector<2x32xf32>
    %92 = vector.extract_strided_slice %84 {offsets = [0, 96], sizes = [2, 32], strides = [1, 1]} : vector<2x128xf32> to vector<2x32xf32>
    %93 = math.tanh %91 : vector<2x32xf32>
    %94 = arith.mulf %92, %93 : vector<2x32xf32>
    %c6 = arith.constant 6 : index
    %c0_32 = arith.constant 0 : index
    %95 = vector.load %arg6[%c6, %c0_32] : memref<16x32xf32, #tpu.memory_space<vmem>>, vector<2x32xf32>
    tpu.vector_store %arg6[%c6, %c0_32], %94 {strides = array<i32>} : memref<16x32xf32, #tpu.memory_space<vmem>>, vector<2x32xf32>,
    %96 = vector.extract_strided_slice %17 {offsets = [8, 0], sizes = [2, 128], strides = [1, 1]} : vector<16x128xf32> to vector<2x128xf32>
    %cst_33 = arith.constant dense<0.000000e+00> : vector<2x128xf32>
    %97 = tpu.matmul %94, %1, %cst_33 {dimension_numbers = #tpu.dot_dimension_numbers<[1], [0], [0], [1], [0, 0, 1, 1], [], []>} : vector<2x32xf32>, vector<32x128xf32>, vector<2x128xf32> -> vector<2x128xf32>
    %98 = arith.addf %96, %97 : vector<2x128xf32>
    %99 = arith.negf %98 : vector<2x128xf32>
    %100 = math.exp %99 : vector<2x128xf32>
    %cst_34 = arith.constant 1.000000e+00 : f32
    %101 = vector.broadcast %cst_34 : f32 to vector<2x128xf32>
    %102 = arith.addf %101, %100 : vector<2x128xf32>
    %103 = arith.divf %101, %102 : vector<2x128xf32>
    %104 = math.tanh %98 : vector<2x128xf32>
    %105 = vector.extract_strided_slice %103 {offsets = [0, 32], sizes = [2, 32], strides = [1, 1]} : vector<2x128xf32> to vector<2x32xf32>
    %106 = arith.mulf %105, %91 : vector<2x32xf32>
    %107 = vector.extract_strided_slice %103 {offsets = [0, 0], sizes = [2, 32], strides = [1, 1]} : vector<2x128xf32> to vector<2x32xf32>
    %108 = vector.extract_strided_slice %104 {offsets = [0, 64], sizes = [2, 32], strides = [1, 1]} : vector<2x128xf32> to vector<2x32xf32>
    %109 = arith.mulf %107, %108 : vector<2x32xf32>
    %110 = arith.addf %106, %109 : vector<2x32xf32>
    %111 = vector.extract_strided_slice %103 {offsets = [0, 96], sizes = [2, 32], strides = [1, 1]} : vector<2x128xf32> to vector<2x32xf32>
    %112 = math.tanh %110 : vector<2x32xf32>
    %113 = arith.mulf %111, %112 : vector<2x32xf32>
    %c8_35 = arith.constant 8 : index
    %c0_36 = arith.constant 0 : index
    %114 = vector.load %arg6[%c8_35, %c0_36] : memref<16x32xf32, #tpu.memory_space<vmem>>, vector<2x32xf32>
    tpu.vector_store %arg6[%c8_35, %c0_36], %113 {strides = array<i32>} : memref<16x32xf32, #tpu.memory_space<vmem>>, vector<2x32xf32>,
    %115 = vector.extract_strided_slice %17 {offsets = [10, 0], sizes = [2, 128], strides = [1, 1]} : vector<16x128xf32> to vector<2x128xf32>
    %cst_37 = arith.constant dense<0.000000e+00> : vector<2x128xf32>
    %116 = tpu.matmul %113, %1, %cst_37 {dimension_numbers = #tpu.dot_dimension_numbers<[1], [0], [0], [1], [0, 0, 1, 1], [], []>} : vector<2x32xf32>, vector<32x128xf32>, vector<2x128xf32> -> vector<2x128xf32>
    %117 = arith.addf %115, %116 : vector<2x128xf32>
    %118 = arith.negf %117 : vector<2x128xf32>
    %119 = math.exp %118 : vector<2x128xf32>
    %cst_38 = arith.constant 1.000000e+00 : f32
    %120 = vector.broadcast %cst_38 : f32 to vector<2x128xf32>
    %121 = arith.addf %120, %119 : vector<2x128xf32>
    %122 = arith.divf %120, %121 : vector<2x128xf32>
    %123 = math.tanh %117 : vector<2x128xf32>
    %124 = vector.extract_strided_slice %122 {offsets = [0, 32], sizes = [2, 32], strides = [1, 1]} : vector<2x128xf32> to vector<2x32xf32>
    %125 = arith.mulf %124, %110 : vector<2x32xf32>
    %126 = vector.extract_strided_slice %122 {offsets = [0, 0], sizes = [2, 32], strides = [1, 1]} : vector<2x128xf32> to vector<2x32xf32>
    %127 = vector.extract_strided_slice %123 {offsets = [0, 64], sizes = [2, 32], strides = [1, 1]} : vector<2x128xf32> to vector<2x32xf32>
    %128 = arith.mulf %126, %127 : vector<2x32xf32>
    %129 = arith.addf %125, %128 : vector<2x32xf32>
    %130 = vector.extract_strided_slice %122 {offsets = [0, 96], sizes = [2, 32], strides = [1, 1]} : vector<2x128xf32> to vector<2x32xf32>
    %131 = math.tanh %129 : vector<2x32xf32>
    %132 = arith.mulf %130, %131 : vector<2x32xf32>
    %c10 = arith.constant 10 : index
    %c0_39 = arith.constant 0 : index
    %133 = vector.load %arg6[%c10, %c0_39] : memref<16x32xf32, #tpu.memory_space<vmem>>, vector<2x32xf32>
    tpu.vector_store %arg6[%c10, %c0_39], %132 {strides = array<i32>} : memref<16x32xf32, #tpu.memory_space<vmem>>, vector<2x32xf32>,
    %134 = vector.extract_strided_slice %17 {offsets = [12, 0], sizes = [2, 128], strides = [1, 1]} : vector<16x128xf32> to vector<2x128xf32>
    %cst_40 = arith.constant dense<0.000000e+00> : vector<2x128xf32>
    %135 = tpu.matmul %132, %1, %cst_40 {dimension_numbers = #tpu.dot_dimension_numbers<[1], [0], [0], [1], [0, 0, 1, 1], [], []>} : vector<2x32xf32>, vector<32x128xf32>, vector<2x128xf32> -> vector<2x128xf32>
    %136 = arith.addf %134, %135 : vector<2x128xf32>
    %137 = arith.negf %136 : vector<2x128xf32>
    %138 = math.exp %137 : vector<2x128xf32>
    %cst_41 = arith.constant 1.000000e+00 : f32
    %139 = vector.broadcast %cst_41 : f32 to vector<2x128xf32>
    %140 = arith.addf %139, %138 : vector<2x128xf32>
    %141 = arith.divf %139, %140 : vector<2x128xf32>
    %142 = math.tanh %136 : vector<2x128xf32>
    %143 = vector.extract_strided_slice %141 {offsets = [0, 32], sizes = [2, 32], strides = [1, 1]} : vector<2x128xf32> to vector<2x32xf32>
    %144 = arith.mulf %143, %129 : vector<2x32xf32>
    %145 = vector.extract_strided_slice %141 {offsets = [0, 0], sizes = [2, 32], strides = [1, 1]} : vector<2x128xf32> to vector<2x32xf32>
    %146 = vector.extract_strided_slice %142 {offsets = [0, 64], sizes = [2, 32], strides = [1, 1]} : vector<2x128xf32> to vector<2x32xf32>
    %147 = arith.mulf %145, %146 : vector<2x32xf32>
    %148 = arith.addf %144, %147 : vector<2x32xf32>
    %149 = vector.extract_strided_slice %141 {offsets = [0, 96], sizes = [2, 32], strides = [1, 1]} : vector<2x128xf32> to vector<2x32xf32>
    %150 = math.tanh %148 : vector<2x32xf32>
    %151 = arith.mulf %149, %150 : vector<2x32xf32>
    %c12 = arith.constant 12 : index
    %c0_42 = arith.constant 0 : index
    %152 = vector.load %arg6[%c12, %c0_42] : memref<16x32xf32, #tpu.memory_space<vmem>>, vector<2x32xf32>
    tpu.vector_store %arg6[%c12, %c0_42], %151 {strides = array<i32>} : memref<16x32xf32, #tpu.memory_space<vmem>>, vector<2x32xf32>,
    %153 = vector.extract_strided_slice %17 {offsets = [14, 0], sizes = [2, 128], strides = [1, 1]} : vector<16x128xf32> to vector<2x128xf32>
    %cst_43 = arith.constant dense<0.000000e+00> : vector<2x128xf32>
    %154 = tpu.matmul %151, %1, %cst_43 {dimension_numbers = #tpu.dot_dimension_numbers<[1], [0], [0], [1], [0, 0, 1, 1], [], []>} : vector<2x32xf32>, vector<32x128xf32>, vector<2x128xf32> -> vector<2x128xf32>
    %155 = arith.addf %153, %154 : vector<2x128xf32>
    %156 = arith.negf %155 : vector<2x128xf32>
    %157 = math.exp %156 : vector<2x128xf32>
    %cst_44 = arith.constant 1.000000e+00 : f32
    %158 = vector.broadcast %cst_44 : f32 to vector<2x128xf32>
    %159 = arith.addf %158, %157 : vector<2x128xf32>
    %160 = arith.divf %158, %159 : vector<2x128xf32>
    %161 = math.tanh %155 : vector<2x128xf32>
    %162 = vector.extract_strided_slice %160 {offsets = [0, 32], sizes = [2, 32], strides = [1, 1]} : vector<2x128xf32> to vector<2x32xf32>
    %163 = arith.mulf %162, %148 : vector<2x32xf32>
    %164 = vector.extract_strided_slice %160 {offsets = [0, 0], sizes = [2, 32], strides = [1, 1]} : vector<2x128xf32> to vector<2x32xf32>
    %165 = vector.extract_strided_slice %161 {offsets = [0, 64], sizes = [2, 32], strides = [1, 1]} : vector<2x128xf32> to vector<2x32xf32>
    %166 = arith.mulf %164, %165 : vector<2x32xf32>
    %167 = arith.addf %163, %166 : vector<2x32xf32>
    %168 = vector.extract_strided_slice %160 {offsets = [0, 96], sizes = [2, 32], strides = [1, 1]} : vector<2x128xf32> to vector<2x32xf32>
    %169 = math.tanh %167 : vector<2x32xf32>
    %170 = arith.mulf %168, %169 : vector<2x32xf32>
    %c14 = arith.constant 14 : index
    %c0_45 = arith.constant 0 : index
    %171 = vector.load %arg6[%c14, %c0_45] : memref<16x32xf32, #tpu.memory_space<vmem>>, vector<2x32xf32>
    tpu.vector_store %arg6[%c14, %c0_45], %170 {strides = array<i32>} : memref<16x32xf32, #tpu.memory_space<vmem>>, vector<2x32xf32>,
    %c0_46 = arith.constant 0 : index
    %c0_47 = arith.constant 0 : index
    %172 = vector.load %arg5[%c0_46, %c0_47] : memref<2x256xf32, #tpu.memory_space<vmem>>, vector<2x32xf32>
    tpu.vector_store %arg5[%c0_46, %c0_47], %170 {strides = array<i32>} : memref<2x256xf32, #tpu.memory_space<vmem>>, vector<2x32xf32>,
    %c0_48 = arith.constant 0 : index
    %c32_49 = arith.constant 32 : index
    %173 = vector.load %arg5[%c0_48, %c32_49] : memref<2x256xf32, #tpu.memory_space<vmem>>, vector<2x32xf32>
    tpu.vector_store %arg5[%c0_48, %c32_49], %167 {strides = array<i32>} : memref<2x256xf32, #tpu.memory_space<vmem>>, vector<2x32xf32>,
    %c0_50 = arith.constant 0 : index
    %c0_51 = arith.constant 0 : index
    %174 = vector.load %arg6[%c0_50, %c0_51] : memref<16x32xf32, #tpu.memory_space<vmem>>, vector<16x32xf32>
    %cst_52 = arith.constant dense<0.000000e+00> : vector<16x128xf32>
    %175 = tpu.matmul %174, %8, %cst_52 {dimension_numbers = #tpu.dot_dimension_numbers<[1], [0], [0], [1], [0, 0, 1, 1], [], []>} : vector<16x32xf32>, vector<32x128xf32>, vector<16x128xf32> -> vector<16x128xf32>
    %176 = vector.broadcast %9 : vector<1x128xf32> to vector<16x128xf32>
    %177 = arith.addf %175, %176 : vector<16x128xf32>
    %178 = vector.extract_strided_slice %177 {offsets = [0, 0], sizes = [16, 12], strides = [1, 1]} : vector<16x128xf32> to vector<16x12xf32>
    %179 = math.exp %178 : vector<16x12xf32>
    %180 = vector.extract_strided_slice %179 {offsets = [0, 0], sizes = [16, 4], strides = [1, 1]} : vector<16x12xf32> to vector<16x4xf32>
    %181 = vector.extract_strided_slice %179 {offsets = [0, 4], sizes = [16, 4], strides = [1, 1]} : vector<16x12xf32> to vector<16x4xf32>
    %182 = vector.extract_strided_slice %179 {offsets = [0, 8], sizes = [16, 4], strides = [1, 1]} : vector<16x12xf32> to vector<16x4xf32>
    %cst_53 = arith.constant 0.000000e+00 : f32
    %183 = vector.broadcast %cst_53 : f32 to vector<2x4xf32>
    %184 = vector.extract_strided_slice %182 {offsets = [0, 0], sizes = [2, 4], strides = [1, 1]} : vector<16x4xf32> to vector<2x4xf32>
    %185 = arith.addf %183, %184 : vector<2x4xf32>
    %186 = vector.extract_strided_slice %182 {offsets = [2, 0], sizes = [2, 4], strides = [1, 1]} : vector<16x4xf32> to vector<2x4xf32>
    %187 = arith.addf %185, %186 : vector<2x4xf32>
    %188 = vector.extract_strided_slice %182 {offsets = [4, 0], sizes = [2, 4], strides = [1, 1]} : vector<16x4xf32> to vector<2x4xf32>
    %189 = arith.addf %187, %188 : vector<2x4xf32>
    %190 = vector.extract_strided_slice %182 {offsets = [6, 0], sizes = [2, 4], strides = [1, 1]} : vector<16x4xf32> to vector<2x4xf32>
    %191 = arith.addf %189, %190 : vector<2x4xf32>
    %192 = vector.extract_strided_slice %182 {offsets = [8, 0], sizes = [2, 4], strides = [1, 1]} : vector<16x4xf32> to vector<2x4xf32>
    %193 = arith.addf %191, %192 : vector<2x4xf32>
    %194 = vector.extract_strided_slice %182 {offsets = [10, 0], sizes = [2, 4], strides = [1, 1]} : vector<16x4xf32> to vector<2x4xf32>
    %195 = arith.addf %193, %194 : vector<2x4xf32>
    %196 = vector.extract_strided_slice %182 {offsets = [12, 0], sizes = [2, 4], strides = [1, 1]} : vector<16x4xf32> to vector<2x4xf32>
    %197 = arith.addf %195, %196 : vector<2x4xf32>
    %198 = vector.extract_strided_slice %182 {offsets = [14, 0], sizes = [2, 4], strides = [1, 1]} : vector<16x4xf32> to vector<2x4xf32>
    %199 = arith.addf %197, %198 : vector<2x4xf32>
    %200 = tpu.concatenate %185, %187, %189, %191, %193, %195, %197, %199 in 0 : vector<2x4xf32>, vector<2x4xf32>, vector<2x4xf32>, vector<2x4xf32>, vector<2x4xf32>, vector<2x4xf32>, vector<2x4xf32>, vector<2x4xf32> -> vector<16x4xf32>
    %201 = tpu.iota {dimensions = array<i32: 1>} : vector<1x10xi32>
    %202 = arith.sitofp %201 : vector<1x10xi32> to vector<1x10xf32>
    %cst_54 = arith.constant 0.000000e+00 : f32
    %203 = vector.broadcast %cst_54 : f32 to vector<16x10xf32>
    %204 = vector.extract_strided_slice %200 {offsets = [0, 0], sizes = [16, 1], strides = [1, 1]} : vector<16x4xf32> to vector<16x1xf32>
    %205 = vector.broadcast %204 : vector<16x1xf32> to vector<16x10xf32>
    %206 = vector.broadcast %202 : vector<1x10xf32> to vector<16x10xf32>
    %207 = arith.subf %205, %206 : vector<16x10xf32>
    %208 = vector.extract_strided_slice %180 {offsets = [0, 0], sizes = [16, 1], strides = [1, 1]} : vector<16x4xf32> to vector<16x1xf32>
    %209 = vector.extract_strided_slice %181 {offsets = [0, 0], sizes = [16, 1], strides = [1, 1]} : vector<16x4xf32> to vector<16x1xf32>
    %cst_55 = arith.constant 0.000000e+00 : f32
    %210 = vector.broadcast %cst_55 : f32 to vector<16x1xf32>
    %211 = arith.subf %210, %209 : vector<16x1xf32>
    %212 = vector.broadcast %211 : vector<16x1xf32> to vector<16x10xf32>
    %213 = arith.mulf %212, %207 : vector<16x10xf32>
    %214 = arith.mulf %213, %207 : vector<16x10xf32>
    %215 = math.exp %214 : vector<16x10xf32>
    %216 = vector.broadcast %208 : vector<16x1xf32> to vector<16x10xf32>
    %217 = arith.mulf %216, %215 : vector<16x10xf32>
    %218 = arith.addf %203, %217 : vector<16x10xf32>
    %219 = vector.extract_strided_slice %200 {offsets = [0, 1], sizes = [16, 1], strides = [1, 1]} : vector<16x4xf32> to vector<16x1xf32>
    %220 = vector.broadcast %219 : vector<16x1xf32> to vector<16x10xf32>
    %221 = vector.broadcast %202 : vector<1x10xf32> to vector<16x10xf32>
    %222 = arith.subf %220, %221 : vector<16x10xf32>
    %223 = vector.extract_strided_slice %180 {offsets = [0, 1], sizes = [16, 1], strides = [1, 1]} : vector<16x4xf32> to vector<16x1xf32>
    %224 = vector.extract_strided_slice %181 {offsets = [0, 1], sizes = [16, 1], strides = [1, 1]} : vector<16x4xf32> to vector<16x1xf32>
    %cst_56 = arith.constant 0.000000e+00 : f32
    %225 = vector.broadcast %cst_56 : f32 to vector<16x1xf32>
    %226 = arith.subf %225, %224 : vector<16x1xf32>
    %227 = vector.broadcast %226 : vector<16x1xf32> to vector<16x10xf32>
    %228 = arith.mulf %227, %222 : vector<16x10xf32>
    %229 = arith.mulf %228, %222 : vector<16x10xf32>
    %230 = math.exp %229 : vector<16x10xf32>
    %231 = vector.broadcast %223 : vector<16x1xf32> to vector<16x10xf32>
    %232 = arith.mulf %231, %230 : vector<16x10xf32>
    %233 = arith.addf %218, %232 : vector<16x10xf32>
    %234 = vector.extract_strided_slice %200 {offsets = [0, 2], sizes = [16, 1], strides = [1, 1]} : vector<16x4xf32> to vector<16x1xf32>
    %235 = vector.broadcast %234 : vector<16x1xf32> to vector<16x10xf32>
    %236 = vector.broadcast %202 : vector<1x10xf32> to vector<16x10xf32>
    %237 = arith.subf %235, %236 : vector<16x10xf32>
    %238 = vector.extract_strided_slice %180 {offsets = [0, 2], sizes = [16, 1], strides = [1, 1]} : vector<16x4xf32> to vector<16x1xf32>
    %239 = vector.extract_strided_slice %181 {offsets = [0, 2], sizes = [16, 1], strides = [1, 1]} : vector<16x4xf32> to vector<16x1xf32>
    %cst_57 = arith.constant 0.000000e+00 : f32
    %240 = vector.broadcast %cst_57 : f32 to vector<16x1xf32>
    %241 = arith.subf %240, %239 : vector<16x1xf32>
    %242 = vector.broadcast %241 : vector<16x1xf32> to vector<16x10xf32>
    %243 = arith.mulf %242, %237 : vector<16x10xf32>
    %244 = arith.mulf %243, %237 : vector<16x10xf32>
    %245 = math.exp %244 : vector<16x10xf32>
    %246 = vector.broadcast %238 : vector<16x1xf32> to vector<16x10xf32>
    %247 = arith.mulf %246, %245 : vector<16x10xf32>
    %248 = arith.addf %233, %247 : vector<16x10xf32>
    %249 = vector.extract_strided_slice %200 {offsets = [0, 3], sizes = [16, 1], strides = [1, 1]} : vector<16x4xf32> to vector<16x1xf32>
    %250 = vector.broadcast %249 : vector<16x1xf32> to vector<16x10xf32>
    %251 = vector.broadcast %202 : vector<1x10xf32> to vector<16x10xf32>
    %252 = arith.subf %250, %251 : vector<16x10xf32>
    %253 = vector.extract_strided_slice %180 {offsets = [0, 3], sizes = [16, 1], strides = [1, 1]} : vector<16x4xf32> to vector<16x1xf32>
    %254 = vector.extract_strided_slice %181 {offsets = [0, 3], sizes = [16, 1], strides = [1, 1]} : vector<16x4xf32> to vector<16x1xf32>
    %cst_58 = arith.constant 0.000000e+00 : f32
    %255 = vector.broadcast %cst_58 : f32 to vector<16x1xf32>
    %256 = arith.subf %255, %254 : vector<16x1xf32>
    %257 = vector.broadcast %256 : vector<16x1xf32> to vector<16x10xf32>
    %258 = arith.mulf %257, %252 : vector<16x10xf32>
    %259 = arith.mulf %258, %252 : vector<16x10xf32>
    %260 = math.exp %259 : vector<16x10xf32>
    %261 = vector.broadcast %253 : vector<16x1xf32> to vector<16x10xf32>
    %262 = arith.mulf %261, %260 : vector<16x10xf32>
    %263 = arith.addf %248, %262 : vector<16x10xf32>
    %264 = tpu.iota {dimensions = array<i32: 0>} : vector<16x10xi32>
    %c1_i32 = arith.constant 1 : i32
    %265 = vector.broadcast %c1_i32 : i32 to vector<16x10xi32>
    %266 = arith.andi %264, %265 : vector<16x10xi32>
    %cst_59 = arith.constant 0.000000e+00 : f32
    %267 = vector.broadcast %cst_59 : f32 to vector<16x16xf32>
    %c0_i32 = arith.constant 0 : i32
    %268 = vector.broadcast %c0_i32 : i32 to vector<16x10xi32>
    %269 = arith.cmpi eq, %266, %268 : vector<16x10xi32>
    %cst_60 = arith.constant 0.000000e+00 : f32
    %270 = vector.broadcast %cst_60 : f32 to vector<16x10xf32>
    %271 = arith.select %269, %263, %270 : vector<16x10xi1>, vector<16x10xf32>
    %c0_61 = arith.constant 0 : index
    %c0_62 = arith.constant 0 : index
    %272 = vector.load %arg1[%c0_61, %c0_62] : memref<20x16xf32, #tpu.memory_space<vmem>>, vector<10x16xf32>
    %cst_63 = arith.constant dense<0.000000e+00> : vector<16x16xf32>
    %273 = tpu.matmul %271, %272, %cst_63 {dimension_numbers = #tpu.dot_dimension_numbers<[1], [0], [0], [1], [0, 0, 1, 1], [], []>} : vector<16x10xf32>, vector<10x16xf32>, vector<16x16xf32> -> vector<16x16xf32>
    %274 = arith.addf %267, %273 : vector<16x16xf32>
    %c1_i32_64 = arith.constant 1 : i32
    %275 = vector.broadcast %c1_i32_64 : i32 to vector<16x10xi32>
    %276 = arith.cmpi eq, %266, %275 : vector<16x10xi32>
    %cst_65 = arith.constant 0.000000e+00 : f32
    %277 = vector.broadcast %cst_65 : f32 to vector<16x10xf32>
    %278 = arith.select %276, %263, %277 : vector<16x10xi1>, vector<16x10xf32>
    %c10_66 = arith.constant 10 : index
    %c0_67 = arith.constant 0 : index
    %279 = vector.load %arg1[%c10_66, %c0_67] : memref<20x16xf32, #tpu.memory_space<vmem>>, vector<10x16xf32>
    %cst_68 = arith.constant dense<0.000000e+00> : vector<16x16xf32>
    %280 = tpu.matmul %278, %279, %cst_68 {dimension_numbers = #tpu.dot_dimension_numbers<[1], [0], [0], [1], [0, 0, 1, 1], [], []>} : vector<16x10xf32>, vector<10x16xf32>, vector<16x16xf32> -> vector<16x16xf32>
    %281 = arith.addf %274, %280 : vector<16x16xf32>
    %cst_69 = arith.constant dense<0.000000e+00> : vector<16x128xf32>
    %282 = tpu.matmul %174, %3, %cst_69 {dimension_numbers = #tpu.dot_dimension_numbers<[1], [0], [0], [1], [0, 0, 1, 1], [], []>} : vector<16x32xf32>, vector<32x128xf32>, vector<16x128xf32> -> vector<16x128xf32>
    %cst_70 = arith.constant dense<0.000000e+00> : vector<16x128xf32>
    %283 = tpu.matmul %281, %4, %cst_70 {dimension_numbers = #tpu.dot_dimension_numbers<[1], [0], [0], [1], [0, 0, 1, 1], [], []>} : vector<16x16xf32>, vector<16x128xf32>, vector<16x128xf32> -> vector<16x128xf32>
    %284 = arith.addf %282, %283 : vector<16x128xf32>
    %cst_71 = arith.constant dense<0.000000e+00> : vector<16x128xf32>
    %285 = tpu.matmul %14, %5, %cst_71 {dimension_numbers = #tpu.dot_dimension_numbers<[1], [0], [0], [1], [0, 0, 1, 1], [], []>} : vector<16x8xf32>, vector<8x128xf32>, vector<16x128xf32> -> vector<16x128xf32>
    %286 = arith.addf %284, %285 : vector<16x128xf32>
    %287 = vector.broadcast %7 : vector<1x128xf32> to vector<16x128xf32>
    %288 = arith.addf %286, %287 : vector<16x128xf32>
    %c0_72 = arith.constant 0 : index
    %c64 = arith.constant 64 : index
    %289 = vector.load %arg3[%c0_72, %c64] : memref<2x128xf32, #tpu.memory_space<vmem>>, vector<2x32xf32>
    %c0_73 = arith.constant 0 : index
    %c96_74 = arith.constant 96 : index
    %290 = vector.load %arg3[%c0_73, %c96_74] : memref<2x128xf32, #tpu.memory_space<vmem>>, vector<2x32xf32>
    %291 = vector.extract_strided_slice %288 {offsets = [0, 0], sizes = [2, 128], strides = [1, 1]} : vector<16x128xf32> to vector<2x128xf32>
    %cst_75 = arith.constant dense<0.000000e+00> : vector<2x128xf32>
    %292 = tpu.matmul %289, %6, %cst_75 {dimension_numbers = #tpu.dot_dimension_numbers<[1], [0], [0], [1], [0, 0, 1, 1], [], []>} : vector<2x32xf32>, vector<32x128xf32>, vector<2x128xf32> -> vector<2x128xf32>
    %293 = arith.addf %291, %292 : vector<2x128xf32>
    %294 = arith.negf %293 : vector<2x128xf32>
    %295 = math.exp %294 : vector<2x128xf32>
    %cst_76 = arith.constant 1.000000e+00 : f32
    %296 = vector.broadcast %cst_76 : f32 to vector<2x128xf32>
    %297 = arith.addf %296, %295 : vector<2x128xf32>
    %298 = arith.divf %296, %297 : vector<2x128xf32>
    %299 = math.tanh %293 : vector<2x128xf32>
    %300 = vector.extract_strided_slice %298 {offsets = [0, 32], sizes = [2, 32], strides = [1, 1]} : vector<2x128xf32> to vector<2x32xf32>
    %301 = arith.mulf %300, %290 : vector<2x32xf32>
    %302 = vector.extract_strided_slice %298 {offsets = [0, 0], sizes = [2, 32], strides = [1, 1]} : vector<2x128xf32> to vector<2x32xf32>
    %303 = vector.extract_strided_slice %299 {offsets = [0, 64], sizes = [2, 32], strides = [1, 1]} : vector<2x128xf32> to vector<2x32xf32>
    %304 = arith.mulf %302, %303 : vector<2x32xf32>
    %305 = arith.addf %301, %304 : vector<2x32xf32>
    %306 = vector.extract_strided_slice %298 {offsets = [0, 96], sizes = [2, 32], strides = [1, 1]} : vector<2x128xf32> to vector<2x32xf32>
    %307 = math.tanh %305 : vector<2x32xf32>
    %308 = arith.mulf %306, %307 : vector<2x32xf32>
    %c0_77 = arith.constant 0 : index
    %c0_78 = arith.constant 0 : index
    %309 = vector.load %arg7[%c0_77, %c0_78] : memref<16x32xf32, #tpu.memory_space<vmem>>, vector<2x32xf32>
    tpu.vector_store %arg7[%c0_77, %c0_78], %308 {strides = array<i32>} : memref<16x32xf32, #tpu.memory_space<vmem>>, vector<2x32xf32>,
    %310 = vector.extract_strided_slice %288 {offsets = [2, 0], sizes = [2, 128], strides = [1, 1]} : vector<16x128xf32> to vector<2x128xf32>
    %cst_79 = arith.constant dense<0.000000e+00> : vector<2x128xf32>
    %311 = tpu.matmul %308, %6, %cst_79 {dimension_numbers = #tpu.dot_dimension_numbers<[1], [0], [0], [1], [0, 0, 1, 1], [], []>} : vector<2x32xf32>, vector<32x128xf32>, vector<2x128xf32> -> vector<2x128xf32>
    %312 = arith.addf %310, %311 : vector<2x128xf32>
    %313 = arith.negf %312 : vector<2x128xf32>
    %314 = math.exp %313 : vector<2x128xf32>
    %cst_80 = arith.constant 1.000000e+00 : f32
    %315 = vector.broadcast %cst_80 : f32 to vector<2x128xf32>
    %316 = arith.addf %315, %314 : vector<2x128xf32>
    %317 = arith.divf %315, %316 : vector<2x128xf32>
    %318 = math.tanh %312 : vector<2x128xf32>
    %319 = vector.extract_strided_slice %317 {offsets = [0, 32], sizes = [2, 32], strides = [1, 1]} : vector<2x128xf32> to vector<2x32xf32>
    %320 = arith.mulf %319, %305 : vector<2x32xf32>
    %321 = vector.extract_strided_slice %317 {offsets = [0, 0], sizes = [2, 32], strides = [1, 1]} : vector<2x128xf32> to vector<2x32xf32>
    %322 = vector.extract_strided_slice %318 {offsets = [0, 64], sizes = [2, 32], strides = [1, 1]} : vector<2x128xf32> to vector<2x32xf32>
    %323 = arith.mulf %321, %322 : vector<2x32xf32>
    %324 = arith.addf %320, %323 : vector<2x32xf32>
    %325 = vector.extract_strided_slice %317 {offsets = [0, 96], sizes = [2, 32], strides = [1, 1]} : vector<2x128xf32> to vector<2x32xf32>
    %326 = math.tanh %324 : vector<2x32xf32>
    %327 = arith.mulf %325, %326 : vector<2x32xf32>
    %c2_81 = arith.constant 2 : index
    %c0_82 = arith.constant 0 : index
    %328 = vector.load %arg7[%c2_81, %c0_82] : memref<16x32xf32, #tpu.memory_space<vmem>>, vector<2x32xf32>
    tpu.vector_store %arg7[%c2_81, %c0_82], %327 {strides = array<i32>} : memref<16x32xf32, #tpu.memory_space<vmem>>, vector<2x32xf32>,
    %329 = vector.extract_strided_slice %288 {offsets = [4, 0], sizes = [2, 128], strides = [1, 1]} : vector<16x128xf32> to vector<2x128xf32>
    %cst_83 = arith.constant dense<0.000000e+00> : vector<2x128xf32>
    %330 = tpu.matmul %327, %6, %cst_83 {dimension_numbers = #tpu.dot_dimension_numbers<[1], [0], [0], [1], [0, 0, 1, 1], [], []>} : vector<2x32xf32>, vector<32x128xf32>, vector<2x128xf32> -> vector<2x128xf32>
    %331 = arith.addf %329, %330 : vector<2x128xf32>
    %332 = arith.negf %331 : vector<2x128xf32>
    %333 = math.exp %332 : vector<2x128xf32>
    %cst_84 = arith.constant 1.000000e+00 : f32
    %334 = vector.broadcast %cst_84 : f32 to vector<2x128xf32>
    %335 = arith.addf %334, %333 : vector<2x128xf32>
    %336 = arith.divf %334, %335 : vector<2x128xf32>
    %337 = math.tanh %331 : vector<2x128xf32>
    %338 = vector.extract_strided_slice %336 {offsets = [0, 32], sizes = [2, 32], strides = [1, 1]} : vector<2x128xf32> to vector<2x32xf32>
    %339 = arith.mulf %338, %324 : vector<2x32xf32>
    %340 = vector.extract_strided_slice %336 {offsets = [0, 0], sizes = [2, 32], strides = [1, 1]} : vector<2x128xf32> to vector<2x32xf32>
    %341 = vector.extract_strided_slice %337 {offsets = [0, 64], sizes = [2, 32], strides = [1, 1]} : vector<2x128xf32> to vector<2x32xf32>
    %342 = arith.mulf %340, %341 : vector<2x32xf32>
    %343 = arith.addf %339, %342 : vector<2x32xf32>
    %344 = vector.extract_strided_slice %336 {offsets = [0, 96], sizes = [2, 32], strides = [1, 1]} : vector<2x128xf32> to vector<2x32xf32>
    %345 = math.tanh %343 : vector<2x32xf32>
    %346 = arith.mulf %344, %345 : vector<2x32xf32>
    %c4_85 = arith.constant 4 : index
    %c0_86 = arith.constant 0 : index
    %347 = vector.load %arg7[%c4_85, %c0_86] : memref<16x32xf32, #tpu.memory_space<vmem>>, vector<2x32xf32>
    tpu.vector_store %arg7[%c4_85, %c0_86], %346 {strides = array<i32>} : memref<16x32xf32, #tpu.memory_space<vmem>>, vector<2x32xf32>,
    %348 = vector.extract_strided_slice %288 {offsets = [6, 0], sizes = [2, 128], strides = [1, 1]} : vector<16x128xf32> to vector<2x128xf32>
    %cst_87 = arith.constant dense<0.000000e+00> : vector<2x128xf32>
    %349 = tpu.matmul %346, %6, %cst_87 {dimension_numbers = #tpu.dot_dimension_numbers<[1], [0], [0], [1], [0, 0, 1, 1], [], []>} : vector<2x32xf32>, vector<32x128xf32>, vector<2x128xf32> -> vector<2x128xf32>
    %350 = arith.addf %348, %349 : vector<2x128xf32>
    %351 = arith.negf %350 : vector<2x128xf32>
    %352 = math.exp %351 : vector<2x128xf32>
    %cst_88 = arith.constant 1.000000e+00 : f32
    %353 = vector.broadcast %cst_88 : f32 to vector<2x128xf32>
    %354 = arith.addf %353, %352 : vector<2x128xf32>
    %355 = arith.divf %353, %354 : vector<2x128xf32>
    %356 = math.tanh %350 : vector<2x128xf32>
    %357 = vector.extract_strided_slice %355 {offsets = [0, 32], sizes = [2, 32], strides = [1, 1]} : vector<2x128xf32> to vector<2x32xf32>
    %358 = arith.mulf %357, %343 : vector<2x32xf32>
    %359 = vector.extract_strided_slice %355 {offsets = [0, 0], sizes = [2, 32], strides = [1, 1]} : vector<2x128xf32> to vector<2x32xf32>
    %360 = vector.extract_strided_slice %356 {offsets = [0, 64], sizes = [2, 32], strides = [1, 1]} : vector<2x128xf32> to vector<2x32xf32>
    %361 = arith.mulf %359, %360 : vector<2x32xf32>
    %362 = arith.addf %358, %361 : vector<2x32xf32>
    %363 = vector.extract_strided_slice %355 {offsets = [0, 96], sizes = [2, 32], strides = [1, 1]} : vector<2x128xf32> to vector<2x32xf32>
    %364 = math.tanh %362 : vector<2x32xf32>
    %365 = arith.mulf %363, %364 : vector<2x32xf32>
    %c6_89 = arith.constant 6 : index
    %c0_90 = arith.constant 0 : index
    %366 = vector.load %arg7[%c6_89, %c0_90] : memref<16x32xf32, #tpu.memory_space<vmem>>, vector<2x32xf32>
    tpu.vector_store %arg7[%c6_89, %c0_90], %365 {strides = array<i32>} : memref<16x32xf32, #tpu.memory_space<vmem>>, vector<2x32xf32>,
    %367 = vector.extract_strided_slice %288 {offsets = [8, 0], sizes = [2, 128], strides = [1, 1]} : vector<16x128xf32> to vector<2x128xf32>
    %cst_91 = arith.constant dense<0.000000e+00> : vector<2x128xf32>
    %368 = tpu.matmul %365, %6, %cst_91 {dimension_numbers = #tpu.dot_dimension_numbers<[1], [0], [0], [1], [0, 0, 1, 1], [], []>} : vector<2x32xf32>, vector<32x128xf32>, vector<2x128xf32> -> vector<2x128xf32>
    %369 = arith.addf %367, %368 : vector<2x128xf32>
    %370 = arith.negf %369 : vector<2x128xf32>
    %371 = math.exp %370 : vector<2x128xf32>
    %cst_92 = arith.constant 1.000000e+00 : f32
    %372 = vector.broadcast %cst_92 : f32 to vector<2x128xf32>
    %373 = arith.addf %372, %371 : vector<2x128xf32>
    %374 = arith.divf %372, %373 : vector<2x128xf32>
    %375 = math.tanh %369 : vector<2x128xf32>
    %376 = vector.extract_strided_slice %374 {offsets = [0, 32], sizes = [2, 32], strides = [1, 1]} : vector<2x128xf32> to vector<2x32xf32>
    %377 = arith.mulf %376, %362 : vector<2x32xf32>
    %378 = vector.extract_strided_slice %374 {offsets = [0, 0], sizes = [2, 32], strides = [1, 1]} : vector<2x128xf32> to vector<2x32xf32>
    %379 = vector.extract_strided_slice %375 {offsets = [0, 64], sizes = [2, 32], strides = [1, 1]} : vector<2x128xf32> to vector<2x32xf32>
    %380 = arith.mulf %378, %379 : vector<2x32xf32>
    %381 = arith.addf %377, %380 : vector<2x32xf32>
    %382 = vector.extract_strided_slice %374 {offsets = [0, 96], sizes = [2, 32], strides = [1, 1]} : vector<2x128xf32> to vector<2x32xf32>
    %383 = math.tanh %381 : vector<2x32xf32>
    %384 = arith.mulf %382, %383 : vector<2x32xf32>
    %c8_93 = arith.constant 8 : index
    %c0_94 = arith.constant 0 : index
    %385 = vector.load %arg7[%c8_93, %c0_94] : memref<16x32xf32, #tpu.memory_space<vmem>>, vector<2x32xf32>
    tpu.vector_store %arg7[%c8_93, %c0_94], %384 {strides = array<i32>} : memref<16x32xf32, #tpu.memory_space<vmem>>, vector<2x32xf32>,
    %386 = vector.extract_strided_slice %288 {offsets = [10, 0], sizes = [2, 128], strides = [1, 1]} : vector<16x128xf32> to vector<2x128xf32>
    %cst_95 = arith.constant dense<0.000000e+00> : vector<2x128xf32>
    %387 = tpu.matmul %384, %6, %cst_95 {dimension_numbers = #tpu.dot_dimension_numbers<[1], [0], [0], [1], [0, 0, 1, 1], [], []>} : vector<2x32xf32>, vector<32x128xf32>, vector<2x128xf32> -> vector<2x128xf32>
    %388 = arith.addf %386, %387 : vector<2x128xf32>
    %389 = arith.negf %388 : vector<2x128xf32>
    %390 = math.exp %389 : vector<2x128xf32>
    %cst_96 = arith.constant 1.000000e+00 : f32
    %391 = vector.broadcast %cst_96 : f32 to vector<2x128xf32>
    %392 = arith.addf %391, %390 : vector<2x128xf32>
    %393 = arith.divf %391, %392 : vector<2x128xf32>
    %394 = math.tanh %388 : vector<2x128xf32>
    %395 = vector.extract_strided_slice %393 {offsets = [0, 32], sizes = [2, 32], strides = [1, 1]} : vector<2x128xf32> to vector<2x32xf32>
    %396 = arith.mulf %395, %381 : vector<2x32xf32>
    %397 = vector.extract_strided_slice %393 {offsets = [0, 0], sizes = [2, 32], strides = [1, 1]} : vector<2x128xf32> to vector<2x32xf32>
    %398 = vector.extract_strided_slice %394 {offsets = [0, 64], sizes = [2, 32], strides = [1, 1]} : vector<2x128xf32> to vector<2x32xf32>
    %399 = arith.mulf %397, %398 : vector<2x32xf32>
    %400 = arith.addf %396, %399 : vector<2x32xf32>
    %401 = vector.extract_strided_slice %393 {offsets = [0, 96], sizes = [2, 32], strides = [1, 1]} : vector<2x128xf32> to vector<2x32xf32>
    %402 = math.tanh %400 : vector<2x32xf32>
    %403 = arith.mulf %401, %402 : vector<2x32xf32>
    %c10_97 = arith.constant 10 : index
    %c0_98 = arith.constant 0 : index
    %404 = vector.load %arg7[%c10_97, %c0_98] : memref<16x32xf32, #tpu.memory_space<vmem>>, vector<2x32xf32>
    tpu.vector_store %arg7[%c10_97, %c0_98], %403 {strides = array<i32>} : memref<16x32xf32, #tpu.memory_space<vmem>>, vector<2x32xf32>,
    %405 = vector.extract_strided_slice %288 {offsets = [12, 0], sizes = [2, 128], strides = [1, 1]} : vector<16x128xf32> to vector<2x128xf32>
    %cst_99 = arith.constant dense<0.000000e+00> : vector<2x128xf32>
    %406 = tpu.matmul %403, %6, %cst_99 {dimension_numbers = #tpu.dot_dimension_numbers<[1], [0], [0], [1], [0, 0, 1, 1], [], []>} : vector<2x32xf32>, vector<32x128xf32>, vector<2x128xf32> -> vector<2x128xf32>
    %407 = arith.addf %405, %406 : vector<2x128xf32>
    %408 = arith.negf %407 : vector<2x128xf32>
    %409 = math.exp %408 : vector<2x128xf32>
    %cst_100 = arith.constant 1.000000e+00 : f32
    %410 = vector.broadcast %cst_100 : f32 to vector<2x128xf32>
    %411 = arith.addf %410, %409 : vector<2x128xf32>
    %412 = arith.divf %410, %411 : vector<2x128xf32>
    %413 = math.tanh %407 : vector<2x128xf32>
    %414 = vector.extract_strided_slice %412 {offsets = [0, 32], sizes = [2, 32], strides = [1, 1]} : vector<2x128xf32> to vector<2x32xf32>
    %415 = arith.mulf %414, %400 : vector<2x32xf32>
    %416 = vector.extract_strided_slice %412 {offsets = [0, 0], sizes = [2, 32], strides = [1, 1]} : vector<2x128xf32> to vector<2x32xf32>
    %417 = vector.extract_strided_slice %413 {offsets = [0, 64], sizes = [2, 32], strides = [1, 1]} : vector<2x128xf32> to vector<2x32xf32>
    %418 = arith.mulf %416, %417 : vector<2x32xf32>
    %419 = arith.addf %415, %418 : vector<2x32xf32>
    %420 = vector.extract_strided_slice %412 {offsets = [0, 96], sizes = [2, 32], strides = [1, 1]} : vector<2x128xf32> to vector<2x32xf32>
    %421 = math.tanh %419 : vector<2x32xf32>
    %422 = arith.mulf %420, %421 : vector<2x32xf32>
    %c12_101 = arith.constant 12 : index
    %c0_102 = arith.constant 0 : index
    %423 = vector.load %arg7[%c12_101, %c0_102] : memref<16x32xf32, #tpu.memory_space<vmem>>, vector<2x32xf32>
    tpu.vector_store %arg7[%c12_101, %c0_102], %422 {strides = array<i32>} : memref<16x32xf32, #tpu.memory_space<vmem>>, vector<2x32xf32>,
    %424 = vector.extract_strided_slice %288 {offsets = [14, 0], sizes = [2, 128], strides = [1, 1]} : vector<16x128xf32> to vector<2x128xf32>
    %cst_103 = arith.constant dense<0.000000e+00> : vector<2x128xf32>
    %425 = tpu.matmul %422, %6, %cst_103 {dimension_numbers = #tpu.dot_dimension_numbers<[1], [0], [0], [1], [0, 0, 1, 1], [], []>} : vector<2x32xf32>, vector<32x128xf32>, vector<2x128xf32> -> vector<2x128xf32>
    %426 = arith.addf %424, %425 : vector<2x128xf32>
    %427 = arith.negf %426 : vector<2x128xf32>
    %428 = math.exp %427 : vector<2x128xf32>
    %cst_104 = arith.constant 1.000000e+00 : f32
    %429 = vector.broadcast %cst_104 : f32 to vector<2x128xf32>
    %430 = arith.addf %429, %428 : vector<2x128xf32>
    %431 = arith.divf %429, %430 : vector<2x128xf32>
    %432 = math.tanh %426 : vector<2x128xf32>
    %433 = vector.extract_strided_slice %431 {offsets = [0, 32], sizes = [2, 32], strides = [1, 1]} : vector<2x128xf32> to vector<2x32xf32>
    %434 = arith.mulf %433, %419 : vector<2x32xf32>
    %435 = vector.extract_strided_slice %431 {offsets = [0, 0], sizes = [2, 32], strides = [1, 1]} : vector<2x128xf32> to vector<2x32xf32>
    %436 = vector.extract_strided_slice %432 {offsets = [0, 64], sizes = [2, 32], strides = [1, 1]} : vector<2x128xf32> to vector<2x32xf32>
    %437 = arith.mulf %435, %436 : vector<2x32xf32>
    %438 = arith.addf %434, %437 : vector<2x32xf32>
    %439 = vector.extract_strided_slice %431 {offsets = [0, 96], sizes = [2, 32], strides = [1, 1]} : vector<2x128xf32> to vector<2x32xf32>
    %440 = math.tanh %438 : vector<2x32xf32>
    %441 = arith.mulf %439, %440 : vector<2x32xf32>
    %c14_105 = arith.constant 14 : index
    %c0_106 = arith.constant 0 : index
    %442 = vector.load %arg7[%c14_105, %c0_106] : memref<16x32xf32, #tpu.memory_space<vmem>>, vector<2x32xf32>
    tpu.vector_store %arg7[%c14_105, %c0_106], %441 {strides = array<i32>} : memref<16x32xf32, #tpu.memory_space<vmem>>, vector<2x32xf32>,
    %c0_107 = arith.constant 0 : index
    %c64_108 = arith.constant 64 : index
    %443 = vector.load %arg5[%c0_107, %c64_108] : memref<2x256xf32, #tpu.memory_space<vmem>>, vector<2x32xf32>
    tpu.vector_store %arg5[%c0_107, %c64_108], %441 {strides = array<i32>} : memref<2x256xf32, #tpu.memory_space<vmem>>, vector<2x32xf32>,
    %c0_109 = arith.constant 0 : index
    %c96_110 = arith.constant 96 : index
    %444 = vector.load %arg5[%c0_109, %c96_110] : memref<2x256xf32, #tpu.memory_space<vmem>>, vector<2x32xf32>
    tpu.vector_store %arg5[%c0_109, %c96_110], %438 {strides = array<i32>} : memref<2x256xf32, #tpu.memory_space<vmem>>, vector<2x32xf32>,
    %c0_111 = arith.constant 0 : index
    %c128 = arith.constant 128 : index
    %445 = vector.load %arg5[%c0_111, %c128] : memref<2x256xf32, #tpu.memory_space<vmem>>, vector<2x4xf32>
    tpu.vector_store %arg5[%c0_111, %c128], %199 {strides = array<i32>} : memref<2x256xf32, #tpu.memory_space<vmem>>, vector<2x4xf32>,
    %c0_112 = arith.constant 0 : index
    %c0_113 = arith.constant 0 : index
    %446 = vector.load %arg7[%c0_112, %c0_113] : memref<16x32xf32, #tpu.memory_space<vmem>>, vector<16x32xf32>
    %cst_114 = arith.constant dense<0.000000e+00> : vector<16x128xf32>
    %447 = tpu.matmul %446, %10, %cst_114 {dimension_numbers = #tpu.dot_dimension_numbers<[1], [0], [0], [1], [0, 0, 1, 1], [], []>} : vector<16x32xf32>, vector<32x128xf32>, vector<16x128xf32> -> vector<16x128xf32>
    %448 = vector.broadcast %11 : vector<1x128xf32> to vector<16x128xf32>
    %449 = arith.addf %447, %448 : vector<16x128xf32>
    %450 = tpu.iota {dimensions = array<i32: 1>} : vector<16x128xi32>
    %c16_i32 = arith.constant 16 : i32
    %451 = vector.broadcast %c16_i32 : i32 to vector<16x128xi32>
    %452 = arith.cmpi sge, %450, %451 : vector<16x128xi32>
    %c20_i32 = arith.constant 20 : i32
    %453 = vector.broadcast %c20_i32 : i32 to vector<16x128xi32>
    %454 = arith.cmpi slt, %450, %453 : vector<16x128xi32>
    %455 = arith.andi %452, %454 : vector<16x128xi1>
    %456 = math.tanh %449 : vector<16x128xf32>
    %457 = arith.select %455, %456, %449 : vector<16x128xi1>, vector<16x128xf32>
    %c0_115 = arith.constant 0 : index
    %c0_116 = arith.constant 0 : index
    %458 = vector.load %arg4[%c0_115, %c0_116] : memref<16x128xf32, #tpu.memory_space<vmem>>, vector<16x128xf32>
    tpu.vector_store %arg4[%c0_115, %c0_116], %457 {strides = array<i32>} : memref<16x128xf32, #tpu.memory_space<vmem>>, vector<16x128xf32>,
    return
  }
}

</mosaic_0001>

<bundles_post_ra>
// kernel: con_gen_forward.1
= control target key start
LH: loop header
LB: loop body
LE: loop exit
PB: predicated region body
PF: predicated region fallthrough
CT: control target
= control target key end

     0   :  { %vm54_vm0 = vcmask 64512   ;;  %v3533_v0 = vmov 0.0|0.0   ;;  %vm3534_vm1 = vmmov 0   ;;  %v3535_v4 = vmov 0.0   ;;  %s3536_s10 = smov 64   ;;  %s3537_s11 = smov 32   ;;  %s4085_s2 = inlined_call_operand.vmem [shape: f32[224,128], index: 2, kind: input, shape index: {}]   ;;  %s4086_s0 = inlined_call_operand.vmem [shape: f32[16,8], index: 0, kind: input, shape index: {}]   ;;  %s4087_s3 = inlined_call_operand.vmem [shape: f32[2,128], index: 3, kind: input, shape index: {}]   ;;  %s4088_s1 = inlined_call_operand.vmem [shape: f32[20,16], index: 1, kind: input, shape index: {}]   ;;  %s4089_s5 = inlined_call_operand.vmem [shape: f32[2,256], index: 5, kind: output, shape index: {1}]   ;;  %s4090_s4 = inlined_call_operand.vmem [shape: f32[16,128], index: 4, kind: output, shape index: {0}]  }
   0x1   :  { %3196 = vmatprep.subr.bf16.mxu1 %v3533_v0  ;;  %v20_v1 = vld [vmem:[%s4085_s2 + $0x8] sm:$0xff]  ;;  %v21_v2 = vld [vmem:[%s4085_s2 + $0x10] sm:$0xff]  ;;  %v19_v3 = vld [vmem:[%s4085_s2] sm:$0xff]  ;;  %2969 = vmatprep.mubr.msk.f32.mxu1 %vm3534_vm1, %v3535_v4  ;;  %vm137_vm2 = vcmask 261120   ;;  %vm240_vm3 = vcmask 254976   ;;  %vm349_vm4 = vcmask 257026  }
   0x2   :  { %v3596_v5 = vpack.c.bf16 %v21_v2, %v20_v1  ;;  %2956 = vmatprep.subr.mxu0 %v19_v3  ;;  %v3601_v6 = vld [vmem:[%s4086_s0] sm:$0xff]  ;;  %v3606_v7 = vld [vmem:[%s4086_s0 + $0x8] sm:$0xff]  ;;  %v22_v8 = vld [vmem:[%s4085_s2 + $0x18] sm:$0xff]  ;;  %vm573_vm5 = vcmask 261126   ;;  %vm461_vm6 = vcmask 259076   ;;  %vm1170_vm7 = vcmask 1041408  }
   0x3   :  { %2957 = vmatpush3.msra.mxu0 %v19_v3  ;;  %2958 = vmatprep.mubr.msk.f32.mxu0 %vm54_vm0, %v3601_v6  ;;  %v23_v9 = vld [vmem:[%s4085_s2 + $0x20] sm:$0xff]  ;;  %v2786_v12 = vld [vmem:[%s4085_s2 + $0x28] ss:$0 sm:$0xff]  ;;  %vm1172_vm8 = vcmask 1043456   ;;  %vm1174_vm9 = vcmask 1045504   ;;  %vm3550_vm10 = vmmov 1  }
   0x4   :  { %3198 = vmatpush3.bf16.msra.mxu1 %v3596_v5  ;;  %2959 = vmatmul.mubr.msk.f32.vlgmr.msra.gmra.mrb[0].mxu0 %vm54_vm0, %v3606_v7  ;;  %v3619_v10 = vpack.c.bf16 %v23_v9, %v22_v8  ;;  %v136_v11 = vld [vmem:[%s4087_s3] sm:$0x3]  ;;  %vm3842_vm11 = vmpackc.low %vm1170_vm7, %vm3550_vm10  ;;  %vm1357_vm13 = vcmask 80896   ;;  %47 = vst [vmem:[%s4089_s5] sm:$0xf] %v3535_v4  ;;  %s3553_s18 = smov 120  }
   0x5   :  { %3199 = vmatprep.subr.bf16.mxu1 %v3533_v0  ;;  %3202 = vmatprep.subr.bf16.mxu0 %v3533_v0 }
   0x6   :  { %3204 = vmatpush3.bf16.msra.mxu0 %v3596_v5  ;;  %2980 = vmatprep.mubr.msk.f32.mxu0 %vm3534_vm1, %v3535_v4 }
   0x7   :  { %3205 = vmatprep.subr.bf16.mxu0 %v3533_v0 }
   0x8   :  { %3201 = vmatpush3.bf16.msra.mxu1 %v3619_v10 }
   0x9   :  { %3208 = vmatprep.subr.bf16.mxu1 %v3533_v0 }
   0xa   :  { %3207 = vmatpush3.bf16.msra.mxu0 %v3619_v10 }
   0xb   :  { %2970 = vmatmul.mubr.msk.f32.vlgmr.msra.gmra.mrb[0].mxu1 %vm137_vm2, %v136_v11  ;;  %3214 = vmatprep.subr.bf16.mxu0 %v3533_v0 }
   0xc   :  { %3210 = vmatpush3.bf16.msra.mxu1 %v3596_v5  ;;  %2991 = vmatprep.mubr.msk.f32.mxu1 %vm3534_vm1, %v3535_v4 }
   0xd   :  { %3211 = vmatprep.subr.bf16.mxu1 %v3533_v0 }
  0x10   :  { %3213 = vmatpush3.bf16.msra.mxu1 %v3619_v10 }
  0x11   :  { %3220 = vmatprep.subr.bf16.mxu1 %v3533_v0 }
  0xd7   :  { %v2960_v13 = vpop.f32.mrb[0].mxu0 }
  0xd8   :  { %v3644_v14 = vadd.f32 %v2960_v13, %v2786_v12  ;;  %v127_v15 = vpop.f32.mrb[1].mxu0 }
  0xd9   :  { %v3646_v16 = vadd.f32 %v2786_v12, %v127_v15 }
  0xde   :  { %v207_v17 = vpop.f32.mrb[0].mxu1 }
  0xdf   :  { %v211_v18 = vadd.f32 %v207_v17, %v3646_v16  ;;  %v2971_v19 = vpop.f32.mrb[1].mxu1 }
  0xe1   :  { %3381 = vtanh.f32 %v211_v18  ;;  %v2790_v21 = vmul.f32 -1.442695, %v211_v18 }
  0xe3   :  { %3383 = vpow2.f32 %v2790_v21 }
  0xeb   :  { %v3382_v20 = vpop.eup %3381 }
  0xec   :  { %221 = vrot.lane.b32.xlu0 %v3382_v20, %s3536_s10 }
  0xed   :  { %v3384_v22 = vpop.eup %3383 }
  0xee   :  { %v215_v23 = vadd.f32 1.0, %v3384_v22 }
  0xf0   :  { %3385 = vrcp.f32 %v215_v23 }
  0xfa   :  { %v3386_v24 = vpop.eup %3385 }
  0xfb   :  { %v219_v27 = vmul.f32 %v3386_v24, %v136_v11 }
 0x15e   :  { %v222_v25 = vpop.permute.xlu0 %221 }
 0x15f   :  { %v224_v26 = vmul.f32 %v3386_v24, %v222_v25 }
 0x161   :  { %226 = vrot.lane.b32.xlu0 %v224_v26, %s3537_s11 }
 0x1d3   :  { %v227_v28 = vpop.permute.xlu0 %226 }
 0x1d4   :  { %v229_v29 = vadd.f32 %v227_v28, %v219_v27 }
 0x1d6   :  { %3387 = vtanh.f32 %v229_v29  ;;  %v326_v45 = vrot.slane %v229_v29, 6 }
 0x1e0   :  { %v3388_v30 = vpop.eup %3387 }
 0x1e1   :  { %232 = vrot.lane.b32.xlu1 %v3388_v30, %s3536_s10 }
 0x253   :  { %v233_v31 = vpop.permute.xlu1 %232 }
 0x254   :  { %v235_v32 = vmul.f32 %v3386_v24, %v233_v31 }
 0x256   :  { %237 = vrot.lane.b32.xlu1 %v235_v32, %s3537_s11 }
 0x2c8   :  { %v238_v33 = vpop.permute.xlu1 %237 }
 0x2c9   :  { %241 = vst.msk [vmem:[#allocation2] sm:$0x3] %vm240_vm3, %v238_v33  ;;  %2981 = vmatmul.mubr.msk.f32.vlgmr.msra.gmra.mrb[2].mxu0 %vm137_vm2, %v238_v33 }
 0x2ca   :  { %3216 = vmatpush3.bf16.msra.mxu0 %v3596_v5  ;;  %3002 = vmatprep.mubr.msk.f32.mxu0 %vm3534_vm1, %v3535_v4 }
 0x2cb   :  { %3217 = vmatprep.subr.bf16.mxu0 %v3533_v0 }
 0x2ce   :  { %3219 = vmatpush3.bf16.msra.mxu0 %v3619_v10 }
 0x2cf   :  { %3226 = vmatprep.subr.bf16.mxu0 %v3533_v0 }
 0x39c   :  { %v310_v34 = vpop.f32.mrb[2].mxu0 }
 0x39d   :  { %v315_v35 = vrot.slane %v310_v34, 6  ;;  %v2982_v36 = vpop.f32.mrb[3].mxu0 }
 0x39f   :  { %v317_v37 = vadd.f32 %v315_v35, %v3646_v16 }
 0x3a1   :  { %3389 = vtanh.f32 %v317_v37  ;;  %v2792_v39 = vmul.f32 -1.442695, %v317_v37 }
 0x3a3   :  { %3391 = vpow2.f32 %v2792_v39 }
 0x3ab   :  { %v3390_v38 = vpop.eup %3389 }
 0x3ac   :  { %330 = vrot.lane.b32.xlu0 %v3390_v38, %s3536_s10 }
 0x3ad   :  { %v3392_v40 = vpop.eup %3391 }
 0x3ae   :  { %v321_v41 = vadd.f32 1.0, %v3392_v40 }
 0x3b0   :  { %3393 = vrcp.f32 %v321_v41 }
 0x3ba   :  { %v3394_v42 = vpop.eup %3393 }
 0x3bb   :  { %v328_v46 = vmul.f32 %v3394_v42, %v326_v45 }
 0x41e   :  { %v331_v43 = vpop.permute.xlu0 %330 }
 0x41f   :  { %v333_v44 = vmul.f32 %v3394_v42, %v331_v43 }
 0x421   :  { %335 = vrot.lane.b32.xlu1 %v333_v44, %s3537_s11 }
 0x493   :  { %v336_v47 = vpop.permute.xlu1 %335 }
 0x494   :  { %v338_v48 = vadd.f32 %v336_v47, %v328_v46 }
 0x496   :  { %3395 = vtanh.f32 %v338_v48  ;;  %v438_v2 = vrot.slane %v338_v48, 6 }
 0x4a0   :  { %v3396_v49 = vpop.eup %3395 }
 0x4a1   :  { %341 = vrot.lane.b32.xlu0 %v3396_v49, %s3536_s10 }
 0x513   :  { %v342_v50 = vpop.permute.xlu0 %341 }
 0x514   :  { %v3665_v51 = vmul.f32 %v3394_v42, %v342_v50 }
 0x516   :  { %v351_v52 = vrot.slane %v3665_v51, 2 }
 0x518   :  { %352 = vrot.lane.b32.xlu1 %v351_v52, %s3537_s11 }
 0x58a   :  { %v353_v53 = vpop.permute.xlu1 %352 }
 0x58b   :  { %2992 = vmatmul.mubr.msk.f32.vlgmr.msra.gmra.mrb[2].mxu1 %vm137_vm2, %v353_v53 }
 0x58c   :  { %3222 = vmatpush3.bf16.msra.mxu1 %v3596_v5  ;;  %3013 = vmatprep.mubr.msk.f32.mxu1 %vm3534_vm1, %v3535_v4 }
 0x58d   :  { %3223 = vmatprep.subr.bf16.mxu1 %v3533_v0 }
 0x590   :  { %3225 = vmatpush3.bf16.msra.mxu1 %v3619_v10 }
 0x591   :  { %3232 = vmatprep.subr.bf16.mxu1 %v3533_v0 }
 0x65e   :  { %v422_v54 = vpop.f32.mrb[2].mxu1 }
 0x65f   :  { %v427_v55 = vrot.slane %v422_v54, 4  ;;  %v2993_v56 = vpop.f32.mrb[3].mxu1 }
 0x661   :  { %v429_v57 = vadd.f32 %v427_v55, %v3646_v16 }
 0x663   :  { %3397 = vtanh.f32 %v429_v57  ;;  %v2794_v59 = vmul.f32 -1.442695, %v429_v57 }
 0x665   :  { %3399 = vpow2.f32 %v2794_v59 }
 0x66d   :  { %v3398_v58 = vpop.eup %3397 }
 0x66e   :  { %442 = vrot.lane.b32.xlu0 %v3398_v58, %s3536_s10 }
 0x66f   :  { %v3400_v60 = vpop.eup %3399 }
 0x670   :  { %v433_v61 = vadd.f32 1.0, %v3400_v60 }
 0x672   :  { %3401 = vrcp.f32 %v433_v61 }
 0x67c   :  { %v3402_v62 = vpop.eup %3401 }
 0x67d   :  { %v440_v3 = vmul.f32 %v3402_v62, %v438_v2 }
 0x6e0   :  { %v443_v63 = vpop.permute.xlu0 %442 }
 0x6e1   :  { %v445_v1 = vmul.f32 %v3402_v62, %v443_v63 }
 0x6e3   :  { %447 = vrot.lane.b32.xlu1 %v445_v1, %s3537_s11 }
 0x755   :  { %v448_v8 = vpop.permute.xlu1 %447 }
 0x756   :  { %v450_v9 = vadd.f32 %v448_v8, %v440_v3 }
 0x758   :  { %3403 = vtanh.f32 %v450_v9  ;;  %v550_v29 = vrot.slane %v450_v9, 6 }
 0x762   :  { %v3404_v11 = vpop.eup %3403 }
 0x763   :  { %453 = vrot.lane.b32.xlu0 %v3404_v11, %s3536_s10 }
 0x7d5   :  { %v454_v12 = vpop.permute.xlu0 %453 }
 0x7d6   :  { %v3680_v13 = vmul.f32 %v3402_v62, %v454_v12 }
 0x7d8   :  { %v463_v15 = vrot.slane %v3680_v13, 4 }
 0x7da   :  { %464 = vrot.lane.b32.xlu1 %v463_v15, %s3537_s11 }
 0x84c   :  { %v465_v17 = vpop.permute.xlu1 %464 }
 0x84d   :  { %3003 = vmatmul.mubr.msk.f32.vlgmr.msra.gmra.mrb[4].mxu0 %vm137_vm2, %v465_v17 }
 0x84e   :  { %3228 = vmatpush3.bf16.msra.mxu0 %v3596_v5  ;;  %3024 = vmatprep.mubr.msk.f32.mxu0 %vm3534_vm1, %v3535_v4 }
 0x84f   :  { %3229 = vmatprep.subr.bf16.mxu0 %v3533_v0 }
 0x852   :  { %3231 = vmatpush3.bf16.msra.mxu0 %v3619_v10 }
 0x853   :  { %3238 = vmatprep.subr.bf16.mxu0 %v3533_v0 }
 0x920   :  { %v534_v18 = vpop.f32.mrb[4].mxu0 }
 0x921   :  { %v539_v19 = vrot.slane %v534_v18, 2  ;;  %v3004_v20 = vpop.f32.mrb[5].mxu0 }
 0x923   :  { %v541_v21 = vadd.f32 %v539_v19, %v3646_v16 }
 0x925   :  { %3405 = vtanh.f32 %v541_v21  ;;  %v2796_v23 = vmul.f32 -1.442695, %v541_v21 }
 0x927   :  { %3407 = vpow2.f32 %v2796_v23 }
 0x92f   :  { %v3406_v22 = vpop.eup %3405 }
 0x930   :  { %554 = vrot.lane.b32.xlu0 %v3406_v22, %s3536_s10 }
 0x931   :  { %v3408_v24 = vpop.eup %3407 }
 0x932   :  { %v545_v25 = vadd.f32 1.0, %v3408_v24 }
 0x934   :  { %3409 = vrcp.f32 %v545_v25 }
 0x93e   :  { %v3410_v26 = vpop.eup %3409 }
 0x93f   :  { %v552_v30 = vmul.f32 %v3410_v26, %v550_v29 }
 0x9a2   :  { %v555_v27 = vpop.permute.xlu0 %554 }
 0x9a3   :  { %v557_v28 = vmul.f32 %v3410_v26, %v555_v27 }
 0x9a5   :  { %559 = vrot.lane.b32.xlu1 %v557_v28, %s3537_s11 }
 0xa17   :  { %v560_v31 = vpop.permute.xlu1 %559 }
 0xa18   :  { %v562_v32 = vadd.f32 %v560_v31, %v552_v30 }
 0xa1a   :  { %3411 = vtanh.f32 %v562_v32  ;;  %v659_v47 = vrot.slane %v562_v32, 6 }
 0xa24   :  { %v3412_v16 = vpop.eup %3411 }
 0xa25   :  { %565 = vrot.lane.b32.xlu0 %v3412_v16, %s3536_s10 }
 0xa97   :  { %v566_v33 = vpop.permute.xlu0 %565 }
 0xa98   :  { %v3695_v34 = vmul.f32 %v3410_v26, %v566_v33 }
 0xa9a   :  { %v575_v35 = vrot.slane %v3695_v34, 6 }
 0xa9c   :  { %576 = vrot.lane.b32.xlu1 %v575_v35, %s3537_s11 }
 0xb0e   :  { %v577_v36 = vpop.permute.xlu1 %576 }
 0xb0f   :  { %3014 = vmatmul.mubr.msk.f32.vlgmr.msra.gmra.mrb[4].mxu1 %vm137_vm2, %v577_v36 }
 0xb10   :  { %3234 = vmatpush3.bf16.msra.mxu1 %v3596_v5  ;;  %3035 = vmatprep.mubr.msk.f32.mxu1 %vm3534_vm1, %v3535_v4 }
 0xb11   :  { %3235 = vmatprep.subr.bf16.mxu1 %v3533_v0 }
 0xb14   :  { %3237 = vmatpush3.bf16.msra.mxu1 %v3619_v10 }
 0xbe2   :  { %v646_v37 = vpop.f32.mrb[4].mxu1 }
 0xbe3   :  { %v650_v38 = vadd.f32 %v646_v37, %v3644_v14  ;;  %v3015_v39 = vpop.f32.mrb[5].mxu1 }
 0xbe5   :  { %3413 = vtanh.f32 %v650_v38  ;;  %v2798_v41 = vmul.f32 -1.442695, %v650_v38 }
 0xbe7   :  { %3415 = vpow2.f32 %v2798_v41 }
 0xbef   :  { %v3414_v40 = vpop.eup %3413 }
 0xbf0   :  { %663 = vrot.lane.b32.xlu0 %v3414_v40, %s3536_s10 }
 0xbf1   :  { %v3416_v42 = vpop.eup %3415 }
 0xbf2   :  { %v654_v43 = vadd.f32 1.0, %v3416_v42 }
 0xbf4   :  { %3417 = vrcp.f32 %v654_v43 }
 0xbfe   :  { %v3418_v44 = vpop.eup %3417 }
 0xbff   :  { %v661_v48 = vmul.f32 %v3418_v44, %v659_v47 }
 0xc62   :  { %v664_v45 = vpop.permute.xlu0 %663 }
 0xc63   :  { %v666_v46 = vmul.f32 %v3418_v44, %v664_v45 }
 0xc65   :  { %668 = vrot.lane.b32.xlu1 %v666_v46, %s3537_s11 }
 0xcd7   :  { %v669_v49 = vpop.permute.xlu1 %668 }
 0xcd8   :  { %v671_v50 = vadd.f32 %v669_v49, %v661_v48 }
 0xcda   :  { %3419 = vtanh.f32 %v671_v50 }
 0xce4   :  { %v3420_v52 = vpop.eup %3419 }
 0xce5   :  { %674 = vrot.lane.b32.xlu0 %v3420_v52, %s3536_s10 }
 0xd57   :  { %v675_v53 = vpop.permute.xlu0 %674 }
 0xd58   :  { %v677_v54 = vmul.f32 %v3418_v44, %v675_v53 }
 0xd5a   :  { %679 = vrot.lane.b32.xlu1 %v677_v54, %s3537_s11 }
 0xdcc   :  { %v680_v55 = vpop.permute.xlu1 %679 }
 0xdcd   :  { %682 = vst.msk [vmem:[#allocation2 + $0x8] sm:$0x3] %vm240_vm3, %v680_v55  ;;  %3025 = vmatmul.mubr.msk.f32.vlgmr.msra.gmra.mrb[6].mxu0 %vm137_vm2, %v680_v55 }
 0xdce   :  { %3240 = vmatpush3.bf16.msra.mxu0 %v3596_v5  ;;  %3046 = vmatprep.mubr.msk.f32.mxu0 %vm3534_vm1, %v3535_v4 }
 0xdcf   :  { %3241 = vmatprep.subr.bf16.mxu0 %v3533_v0 }
 0xdd2   :  { %3243 = vmatpush3.bf16.msra.mxu0 %v3619_v10  ;;  %v767_v10 = vrot.slane %v671_v50, 6 }
 0xea0   :  { %v751_v56 = vpop.f32.mrb[6].mxu0 }
 0xea1   :  { %v756_v57 = vrot.slane %v751_v56, 6  ;;  %v3026_v58 = vpop.f32.mrb[7].mxu0  ;;  %v37_v56 = vld [vmem:[%s4085_s2 + $0x90] sm:$0xff] }
 0xea3   :  { %v758_v59 = vadd.f32 %v756_v57, %v3644_v14  ;;  %v38_v57 = vld [vmem:[%s4085_s2 + $0x98] sm:$0xff] }
 0xea4   :  { %v3244_v58 = vpack.c.bf16 %v38_v57, %v37_v56  ;;  %v3543_v57 = vmov 8  }
 0xea5   :  { %3421 = vtanh.f32 %v758_v59  ;;  %v2800_v61 = vmul.f32 -1.442695, %v758_v59  ;;  %v39_v59 = vld [vmem:[%s4085_s2 + $0xa0] sm:$0xff] }
 0xea6   :  { %3245 = vmatprep.subr.bf16.mxu1 %v3244_v58 }
 0xea7   :  { %3423 = vpow2.f32 %v2800_v61  ;;  %v25_v61 = vld [vmem:[%s4085_s2 + $0x30] sm:$0xff] }
 0xeaf   :  { %v3422_v60 = vpop.eup %3421 }
 0xeb0   :  { %771 = vrot.lane.b32.xlu0 %v3422_v60, %s3536_s10  ;;  %v40_v60 = vld [vmem:[%s4085_s2 + $0xa8] sm:$0xff] }
 0xeb1   :  { %v3424_v62 = vpop.eup %3423 }
 0xeb2   :  { %v762_v5 = vadd.f32 1.0, %v3424_v62  ;;  %v3248_v62 = vpack.c.bf16 %v40_v60, %v39_v59  ;;  %v3545_v60 = vmov 11  }
 0xeb4   :  { %3425 = vrcp.f32 %v762_v5 }
 0xebe   :  { %v3426_v63 = vpop.eup %3425 }
 0xebf   :  { %v769_v3 = vmul.f32 %v3426_v63, %v767_v10 }
 0xf22   :  { %v772_v1 = vpop.permute.xlu0 %771 }
 0xf23   :  { %v774_v2 = vmul.f32 %v3426_v63, %v772_v1 }
 0xf25   :  { %776 = vrot.lane.b32.xlu1 %v774_v2, %s3537_s11 }
 0xf97   :  { %v777_v8 = vpop.permute.xlu1 %776 }
 0xf98   :  { %v779_v9 = vadd.f32 %v777_v8, %v769_v3 }
 0xf9a   :  { %3427 = vtanh.f32 %v779_v9  ;;  %v878_v30 = vrot.slane %v779_v9, 6  ;;  %v27_v9 = vld [vmem:[%s4085_s2 + $0x40] sm:$0xff] }
 0xfa4   :  { %v3428_v11 = vpop.eup %3427 }
 0xfa5   :  { %782 = vrot.lane.b32.xlu0 %v3428_v11, %s3536_s10  ;;  %v28_v11 = vld [vmem:[%s4085_s2 + $0x48] sm:$0xff] }
0x1017   :  { %v783_v12 = vpop.permute.xlu0 %782 }
0x1018   :  { %v3721_v15 = vmul.f32 %v3426_v63, %v783_v12  ;;  %v3272_v12 = vpack.c.bf16 %v28_v11, %v27_v9  ;;  %v1350_v9 = vld [vmem:[%s4088_s1 + $0x8] sm:$0x3] }
0x101a   :  { %v791_v17 = vrot.slane %v3721_v15, 2 }
0x101c   :  { %792 = vrot.lane.b32.xlu1 %v791_v17, %s3537_s11  ;;  %v31_v17 = vld [vmem:[%s4085_s2 + $0x60] sm:$0xff] }
0x108e   :  { %v793_v18 = vpop.permute.xlu1 %792 }
0x108f   :  { %3036 = vmatmul.mubr.msk.f32.vlgmr.msra.gmra.mrb[6].mxu1 %vm137_vm2, %v793_v18  ;;  %v3538_v18 = vmov 5  }
0x1090   :  { %3247 = vmatpush3.bf16.msra.mxu1 %v3244_v58  ;;  %3360 = vset.pattern.permute.xlu1 %v3538_v18  ;;  %v3544_v58 = vmov 10  }
0x1091   :  { %3249 = vmatprep.subr.bf16.mxu1 %v3248_v62 }
0x1094   :  { %3251 = vmatpush3.bf16.msra.mxu1 %v3248_v62  ;;  %v3547_v62 = vmov 2  }
0x1162   :  { %v862_v19 = vpop.f32.mrb[6].mxu1 }
0x1163   :  { %v867_v20 = vrot.slane %v862_v19, 4  ;;  %v3037_v21 = vpop.f32.mrb[7].mxu1  ;;  %v3539_v19 = vmov 4  }
0x1164   :  { %3359 = vset.pattern.permute.xlu0 %v3539_v19 }
0x1165   :  { %v869_v22 = vadd.f32 %v867_v20, %v3644_v14  ;;  %v2805_v20 = vld [vmem:[%s4085_s2 + $0xb0] ss:$0 sm:$0xff] }
0x1167   :  { %3429 = vtanh.f32 %v869_v22  ;;  %v2802_v24 = vmul.f32 -1.442695, %v869_v22 }
0x1169   :  { %3431 = vpow2.f32 %v2802_v24 }
0x1171   :  { %v3430_v23 = vpop.eup %3429 }
0x1172   :  { %882 = vrot.lane.b32.xlu0 %v3430_v23, %s3536_s10 }
0x1173   :  { %v3432_v25 = vpop.eup %3431 }
0x1174   :  { %v873_v26 = vadd.f32 1.0, %v3432_v25 }
0x1176   :  { %3433 = vrcp.f32 %v873_v26 }
0x1180   :  { %v3434_v27 = vpop.eup %3433 }
0x1181   :  { %v880_v31 = vmul.f32 %v3434_v27, %v878_v30 }
0x11e4   :  { %v883_v28 = vpop.permute.xlu0 %882 }
0x11e5   :  { %v885_v29 = vmul.f32 %v3434_v27, %v883_v28 }
0x11e7   :  { %887 = vrot.lane.b32.xlu1 %v885_v29, %s3537_s11 }
0x1259   :  { %v888_v32 = vpop.permute.xlu1 %887 }
0x125a   :  { %v890_v16 = vadd.f32 %v888_v32, %v880_v31 }
0x125c   :  { %3435 = vtanh.f32 %v890_v16 }
0x1266   :  { %v3436_v33 = vpop.eup %3435 }
0x1267   :  { %893 = vrot.lane.b32.xlu0 %v3436_v33, %s3536_s10 }
0x12d9   :  { %v894_v35 = vpop.permute.xlu0 %893 }
0x12da   :  { %v896_v36 = vmul.f32 %v3434_v27, %v894_v35 }
0x12dc   :  { %v902_v37 = vrot.slane %v896_v36, 4 }
0x12de   :  { %903 = vrot.lane.b32.xlu1 %v902_v37, %s3537_s11 }
0x1350   :  { %v904_v38 = vpop.permute.xlu1 %903 }
0x1351   :  { %3047 = vmatmul.mubr.msk.f32.vlgmr.msra.gmra.mrb[8].mxu0 %vm137_vm2, %v904_v38 }
0x1424   :  { %v973_v39 = vpop.f32.mrb[8].mxu0 }
0x1425   :  { %v978_v40 = vrot.slane %v973_v39, 2  ;;  %v3048_v41 = vpop.f32.mrb[9].mxu0 }
0x1427   :  { %v980_v42 = vadd.f32 %v978_v40, %v3644_v14  ;;  %v989_v14 = vrot.slane %v890_v16, 6 }
0x1429   :  { %3437 = vtanh.f32 %v980_v42  ;;  %v2804_v44 = vmul.f32 -1.442695, %v980_v42 }
0x142b   :  { %3439 = vpow2.f32 %v2804_v44 }
0x1433   :  { %v3438_v43 = vpop.eup %3437 }
0x1434   :  { %993 = vrot.lane.b32.xlu0 %v3438_v43, %s3536_s10 }
0x1435   :  { %v3440_v45 = vpop.eup %3439 }
0x1436   :  { %v984_v46 = vadd.f32 1.0, %v3440_v45 }
0x1438   :  { %3441 = vrcp.f32 %v984_v46 }
0x1442   :  { %v3442_v47 = vpop.eup %3441 }
0x1443   :  { %v991_v50 = vmul.f32 %v3442_v47, %v989_v14  ;;  %v3541_v14 = vmov 7  }
0x14a6   :  { %v994_v48 = vpop.permute.xlu0 %993 }
0x14a7   :  { %v996_v49 = vmul.f32 %v3442_v47, %v994_v48 }
0x14a9   :  { %998 = vrot.lane.b32.xlu1 %v996_v49, %s3537_s11 }
0x14ad   :  { %346 = vrot.lane.b32.xlu1 %v3665_v51, %s3537_s11 }
0x14b1   :  { %570 = vrot.lane.b32.xlu1 %v3695_v34, %s3537_s11 }
0x14b5   :  { %898 = vrot.lane.b32.xlu1 %v896_v36, %s3537_s11  ;;  %v3540_v36 = vmov 6  }
0x151b   :  { %v999_v52 = vpop.permute.xlu1 %998 }
0x151c   :  { %v3740_v53 = vadd.f32 %v999_v52, %v991_v50 }
0x151e   :  { %3443 = vtanh.f32 %v3740_v53 }
0x151f   :  { %v347_v54 = vpop.permute.xlu1 %346 }
0x1520   :  { %350 = vst.msk [vmem:[#allocation2] sm:$0xc] %vm349_vm4, %v347_v54 }
0x1523   :  { %v571_v55 = vpop.permute.xlu1 %570 }
0x1524   :  { %574 = vst.msk [vmem:[#allocation2] sm:$0xc0] %vm573_vm5, %v571_v55  ;;  %v3542_v55 = vmov 9  }
0x1527   :  { %v899_v51 = vpop.permute.xlu1 %898 }
0x1528   :  { %v3444_v34 = vpop.eup %3443  ;;  %901 = vst.msk [vmem:[#allocation2 + $0x8] sm:$0x30] %vm461_vm6, %v899_v51 }
0x1529   :  { %1004 = vrot.lane.b32.xlu0 %v3444_v34, %s3536_s10 }
0x152d   :  { %458 = vrot.lane.b32.xlu0 %v3680_v13, %s3537_s11  ;;  %v26_v13 = vld [vmem:[%s4085_s2 + $0x38] sm:$0xff] }
0x152e   :  { %v3268_v5 = vpack.c.bf16 %v26_v13, %v25_v61  ;;  %v3546_v61 = vmov 0   ;;  %v3548_v13 = vmov 3  }
0x1530   :  { %3269 = vmatprep.subr.bf16.mxu1 %v3268_v5 }
0x1531   :  { %787 = vrot.lane.b32.xlu0 %v3721_v15, %s3537_s11 }
0x159b   :  { %v1005_v63 = vpop.permute.xlu0 %1004 }
0x159c   :  { %v3769_v1 = vmul.f32 %v3442_v47, %v1005_v63  ;;  %v1355_v63 = vld [vmem:[%s4088_s1 + $0xa] sm:$0xff] }
0x159e   :  { %1009 = vrot.lane.b32.xlu0 %v3769_v1, %s3537_s11 }
0x159f   :  { %v459_v2 = vpop.permute.xlu0 %458 }
0x15a0   :  { %462 = vst.msk [vmem:[#allocation2] sm:$0x30] %vm461_vm6, %v459_v2  ;;  %v1356_v2 = vld [vmem:[%s4088_s1 + $0x12] sm:$0x3] }
0x15a3   :  { %v788_v10 = vpop.permute.xlu0 %787 }
0x15a4   :  { %790 = vst.msk [vmem:[#allocation2 + $0x8] sm:$0xc] %vm349_vm4, %v788_v10  ;;  %v3252_v10 = vpack.c.bf16 %v1356_v2, %v1355_v63 }
0x15a6   :  { %3254 = vmatprep.subr.msk.bf16.mxu0 %vm3842_vm11, %v3252_v10 }
0x15a7   :  { %v1039_v3 = vld [vmem:[#allocation2] sm:$0xff]  ;;  %3257 = vmatpush3.bf16.msk.msra.mxu0 %vm3842_vm11, %v3252_v10 }
0x15a8   :  { %3057 = vmatprep.mubr.msk.f32.mxu1 %vm137_vm2, %v1039_v3 }
0x1610   :  { %v1010_v8 = vpop.permute.xlu0 %1009 }
0x1611   :  { %1012 = vst.msk [vmem:[#allocation2 + $0x8] sm:$0xc0] %vm573_vm5, %v1010_v8  ;;  %v1349_v8 = vld [vmem:[%s4088_s1] sm:$0xff] }
0x1612   :  { %v3856_v11 = vpack.c.bf16 %v1350_v9, %v1349_v8 }
0x1614   :  { %3260 = vmatprep.subr.msk.bf16.mxu0 %vm3842_vm11, %v3856_v11 }
0x1618   :  { %v1040_v15 = vld [vmem:[#allocation2 + $0x8] sm:$0xff] }
0x1619   :  { %3058 = vmatmul.mubr.msk.f32.vlgmr.msra.gmra.mrb[8].mxu1 %vm137_vm2, %v1040_v15 }
0x161a   :  { %3271 = vmatpush3.bf16.msra.mxu1 %v3268_v5  ;;  %3089 = vmatprep.mubr.msk.f32.mxu1 %vm137_vm2, %v1039_v3  ;;  %v3549_v5 = vmov 1  }
0x161b   :  { %3273 = vmatprep.subr.bf16.mxu1 %v3272_v12 }
0x161e   :  { %3275 = vmatpush3.bf16.msra.mxu1 %v3272_v12  ;;  %v1766_v12 = vld [vmem:[%s4087_s3] sm:$0x3]  ;;  %s3552_s3 = smov 96  }
0x161f   :  { %3092 = vmatprep.subr.mxu1 %v31_v17 }
0x1621   :  { %3090 = vmatmul.mubr.msk.f32.vlgmr.msra.gmra.mrb[10].mxu1 %vm137_vm2, %v1040_v15 }
0x1622   :  { %3093 = vmatpush3.msra.mxu1 %v31_v17  ;;  %3094 = vmatprep.mubr.msk.f32.mxu1 %vm54_vm0, %v3601_v6 }
0x1623   :  { %3288 = vmatprep.subr.bf16.mxu1 %v3533_v0 }
0x1629   :  { %3095 = vmatmul.mubr.msk.f32.vlgmr.msra.gmra.mrb[10].mxu1 %vm54_vm0, %v3606_v7 }
0x162a   :  { %3127 = vmatprep.mubr.msk.f32.mxu1 %vm3534_vm1, %v3535_v4 }
0x16ec   :  { %v3059_v21 = vpop.f32.mrb[8].mxu1 }
0x16ed   :  { %v1123_v22 = vadd.f32 %v3059_v21, %v2805_v20  ;;  %v1117_v23 = vpop.f32.mrb[9].mxu1 }
0x16ee   :  { %v1118_v6 = vadd.f32 %v2805_v20, %v1117_v23  ;;  %v1017_v23 = vlaneseq }
0x16ef   :  { %v1128_v24 = vmul.f32 1.442695, %v1123_v22 }
0x16f0   :  { %v1126_v25 = vmul.f32 1.442695, %v1118_v6 }
0x16f1   :  { %3445 = vpow2.f32 %v1128_v24 }
0x16f2   :  { %3447 = vpow2.f32 %v1126_v25  ;;  %v3865_v25 = vand.u32 127, %v1017_v23 }
0x16fb   :  { %v3799_v7 = vpop.eup %3445 }
0x16fc   :  { %v3801_v26 = vpop.eup %3447  ;;  %v3803_v27 = vpop.f32.mrb[10].mxu1  ;;  %v1195_v28 = vsub.f32 0.0, %v3799_v7  ;;  %v1143_v41 = vrot.slane %v3799_v7, 2  ;;  %v1146_v44 = vrot.slane %v3799_v7, 4  ;;  %v1149_v48 = vrot.slane %v3799_v7, 6 }
0x16fd   :  { %v3806_v29 = vpop.f32.mrb[11].mxu1  ;;  %v1132_v30 = vrot.slane %v3801_v26, 2  ;;  %v1135_v32 = vrot.slane %v3801_v26, 4  ;;  %v1194_v16 = vsub.f32 0.0, %v3801_v26  ;;  %v1138_v35 = vrot.slane %v3801_v26, 6 }
0x16fe   :  { %1241 = vperm.xlu1 %3360, %v1195_v28   ;;  %1203 = vperm.xlu0 %3359, %v1195_v28  }
0x16ff   :  { %v1134_v31 = vadd.f32 %v3801_v26, %v1132_v30 }
0x1701   :  { %v1137_v33 = vadd.f32 %v1135_v32, %v1134_v31  ;;  %v1153_v37 = vrot.slane %v1134_v31, 6 }
0x1702   :  { %3361 = vset.pattern.permute.xlu0 %v3540_v36  ;;  %1237 = vperm.xlu1 %3360, %v1194_v16  }
0x1703   :  { %1279 = vperm.xlu0 %3361, %v1195_v28   ;;  %v1140_v38 = vadd.f32 %v1138_v35, %v1137_v33  ;;  %v1156_v39 = vrot.slane %v1137_v33, 4  ;;  %v1171_v42 = vsel %vm1170_vm7, %v3801_v26, %v1153_v37 }
0x1705   :  { %v1141_v40 = vadd.f32 %v3799_v7, %v1140_v38  ;;  %v1159_v45 = vrot.slane %v1140_v38, 2  ;;  %v1173_v46 = vsel %vm1172_vm8, %v1171_v42, %v1156_v39 }
0x1706   :  { %3363 = vset.pattern.permute.xlu1 %v3540_v36 }
0x1707   :  { %3362 = vset.pattern.permute.xlu0 %v3539_v19  ;;  %1275 = vperm.xlu1 %3363, %v1194_v16   ;;  %v1145_v43 = vadd.f32 %v1143_v41, %v1141_v40  ;;  %v1175_v51 = vsel %vm1174_vm9, %v1173_v46, %v1159_v45 }
0x1708   :  { %1198 = vperm.xlu0 %3362, %v1194_v16  }
0x1709   :  { %v1148_v47 = vadd.f32 %v1146_v44, %v1145_v43  ;;  %v1162_v49 = vrot.slane %v1145_v43, 6 }
0x170b   :  { %3364 = vset.pattern.permute.xlu1 %v3541_v14  ;;  %v3820_v50 = vadd.f32 %v1149_v48, %v1148_v47  ;;  %v1165_v52 = vrot.slane %v1148_v47, 4  ;;  %v1176_v54 = vsel %vm1170_vm7, %v1141_v40, %v1162_v49  ;;  %vm1526_vm7 = vcmask 130048  }
0x170c   :  { %1313 = vperm.xlu1 %3364, %v1194_v16   ;;  %3366 = vset.pattern.permute.xlu0 %v3542_v55 }
0x170d   :  { %1227 = vperm.xlu0 %3366, %v1175_v51   ;;  %v1168_v34 = vrot.slane %v3820_v50, 2  ;;  %v1177_v56 = vsel %vm1172_vm8, %v1176_v54, %v1165_v52  ;;  %vm2668_vm8 = vcmask 1042176  }
0x170f   :  { %v1178_v59 = vsel %vm1174_vm9, %v1177_v56, %v1168_v34 }
0x1710   :  { %3365 = vset.pattern.permute.xlu1 %v3543_v57 }
0x1711   :  { %3371 = vset.pattern.permute.xlu0 %v3544_v58  ;;  %1184 = vperm.xlu1 %3365, %v1175_v51  }
0x1712   :  { %1269 = vperm.xlu0 %3371, %v1178_v59  }
0x1715   :  { %3367 = vset.pattern.permute.xlu1 %v3544_v58 }
0x1716   :  { %1265 = vperm.xlu1 %3367, %v1175_v51   ;;  %3372 = vset.pattern.permute.xlu0 %v3541_v14 }
0x1717   :  { %1317 = vperm.xlu0 %3372, %v1195_v28  }
0x171a   :  { %3368 = vset.pattern.permute.xlu1 %v3545_v60 }
0x171b   :  { %1303 = vperm.xlu1 %3368, %v1175_v51   ;;  %3376 = vset.pattern.permute.xlu0 %v3546_v61 }
0x171c   :  { %1219 = vperm.xlu0 %3376, %v3799_v7  }
0x171f   :  { %3369 = vset.pattern.permute.xlu1 %v3543_v57 }
0x1720   :  { %3378 = vset.pattern.permute.xlu0 %v3547_v62  ;;  %1189 = vperm.xlu1 %3369, %v1178_v59  }
0x1721   :  { %1295 = vperm.xlu0 %3378, %v3799_v7  }
0x1724   :  { %3370 = vset.pattern.permute.xlu1 %v3542_v55 }
0x1725   :  { %1231 = vperm.xlu1 %3370, %v1178_v59   ;;  %3380 = vset.pattern.permute.xlu0 %v3548_v13 }
0x1726   :  { %1768 = vrot.lane.b32.xlu0 %v1766_v12, %s3536_s10 }
0x1729   :  { %3373 = vset.pattern.permute.xlu1 %v3546_v61 }
0x172a   :  { %1215 = vperm.xlu1 %3373, %v3801_v26  }
0x172e   :  { %3374 = vset.pattern.permute.xlu1 %v3545_v60 }
0x172f   :  { %1307 = vperm.xlu1 %3374, %v1178_v59  }
0x1733   :  { %3375 = vset.pattern.permute.xlu1 %v3549_v5 }
0x1734   :  { %1253 = vperm.xlu1 %3375, %v3801_v26  }
0x1738   :  { %1257 = vperm.xlu1 %3375, %v3799_v7  }
0x173c   :  { %3377 = vset.pattern.permute.xlu1 %v3547_v62 }
0x173d   :  { %1291 = vperm.xlu1 %3377, %v3801_v26  }
0x1741   :  { %3379 = vset.pattern.permute.xlu1 %v3548_v13 }
0x1742   :  { %1329 = vperm.xlu1 %3379, %v3801_v26   ;;  %v1181_v26 = vcvt.s32.f32 %v3865_v25 }
0x1746   :  { %1333 = vperm.xlu1 %3379, %v3799_v7  }
0x177d   :  { %v1242_v15 = vpop.permute.xlu1 %1241  ;;  %v1204_v19 = vpop.permute.xlu0 %1203 }
0x1781   :  { %v1238_v17 = vpop.permute.xlu1 %1237 }
0x1782   :  { %v1280_v21 = vpop.permute.xlu0 %1279 }
0x1786   :  { %v1276_v18 = vpop.permute.xlu1 %1275 }
0x1787   :  { %v1199_v24 = vpop.permute.xlu0 %1198 }
0x178b   :  { %v1314_v20 = vpop.permute.xlu1 %1313 }
0x178c   :  { %v1228_v28 = vpop.permute.xlu0 %1227 }
0x178d   :  { %v1234_v30 = vsub.f32 %v1228_v28, %v1181_v26 }
0x178f   :  { %v1244_v33 = vmul.f32 %v1238_v17, %v1234_v30 }
0x1790   :  { %v1185_v22 = vpop.permute.xlu1 %1184 }
0x1791   :  { %v1192_v32 = vsub.f32 %v1185_v22, %v1181_v26  ;;  %v1270_v35 = vpop.permute.xlu0 %1269  ;;  %v1246_v42 = vmul.f32 %v1244_v33, %v1234_v30  ;;  %v3868_v22 = vshrl.u32 %v1017_v23, 7 }
0x1792   :  { %v1273_v40 = vsub.f32 %v1270_v35, %v1181_v26 }
0x1793   :  { %v1206_v37 = vmul.f32 %v1199_v24, %v1192_v32  ;;  %v1248_v52 = vmul.f32 1.442695, %v1246_v42  ;;  %v1342_v28 = vadd.s32 8, %v3868_v22  ;;  %v1343_v30 = vand.u32 1, %v3868_v22 }
0x1794   :  { %v1283_v49 = vmul.f32 %v1280_v21, %v1273_v40 }
0x1795   :  { %v1266_v6 = vpop.permute.xlu1 %1265  ;;  %v1208_v46 = vmul.f32 %v1206_v37, %v1192_v32  ;;  %3449 = vpow2.f32 %v1248_v52  ;;  %vm1351_vm12 = vcmp.eq.s32.totalorder %v1343_v30, 1  ;;  %vm1345_vm15 = vcmp.eq.s32.totalorder %v1343_v30, 0 }
0x1796   :  { %v1272_v16 = vsub.f32 %v1266_v6, %v1181_v26  ;;  %v1285_v56 = vmul.f32 %v1283_v49, %v1273_v40  ;;  %v1318_v62 = vpop.permute.xlu0 %1317  ;;  %v1344_v40 = vand.u32 1, %v1342_v28 }
0x1797   :  { %v1210_v51 = vmul.f32 1.442695, %v1208_v46 }
0x1798   :  { %v1282_v41 = vmul.f32 %v1276_v18, %v1272_v16  ;;  %v1288_v5 = vmul.f32 1.442695, %v1285_v56  ;;  %vm1352_vm14 = vcmp.eq.s32.totalorder %v1344_v40, 1  ;;  %vm1346_vm0 = vcmp.eq.s32.totalorder %v1344_v40, 0  ;;  %v35_v56 = vld [vmem:[%s4085_s2 + $0x80] sm:$0xff] }
0x1799   :  { %3451 = vpow2.f32 %v1210_v51  ;;  %v32_v51 = vld [vmem:[%s4085_s2 + $0x68] sm:$0xff] }
0x179a   :  { %v1304_v7 = vpop.permute.xlu1 %1303  ;;  %v1284_v14 = vmul.f32 %v1282_v41, %v1272_v16 }
0x179b   :  { %v1310_v43 = vsub.f32 %v1304_v7, %v1181_v26  ;;  %v1220_v6 = vpop.permute.xlu0 %1219 }
0x179c   :  { %v1286_v57 = vmul.f32 1.442695, %v1284_v14 }
0x179d   :  { %v1320_v54 = vmul.f32 %v1314_v20, %v1310_v43 }
0x179f   :  { %v1190_v31 = vpop.permute.xlu1 %1189  ;;  %v1322_v59 = vmul.f32 %v1320_v54, %v1310_v43  ;;  %v3450_v12 = vpop.eup %3449 }
0x17a0   :  { %v1193_v36 = vsub.f32 %v1190_v31, %v1181_v26 }
0x17a1   :  { %v1324_v63 = vmul.f32 1.442695, %v1322_v59 }
0x17a2   :  { %v1207_v44 = vmul.f32 %v1204_v19, %v1193_v36 }
0x17a4   :  { %v1232_v38 = vpop.permute.xlu1 %1231  ;;  %v1209_v55 = vmul.f32 %v1207_v44, %v1193_v36 }
0x17a5   :  { %v1235_v39 = vsub.f32 %v1232_v38, %v1181_v26 }
0x17a6   :  { %v1212_v60 = vmul.f32 1.442695, %v1209_v55 }
0x17a7   :  { %v1245_v45 = vmul.f32 %v1242_v15, %v1235_v39  ;;  %v3452_v15 = vpop.eup %3451 }
0x17a9   :  { %v1247_v47 = vmul.f32 %v1245_v45, %v1235_v39  ;;  %v1216_v48 = vpop.permute.xlu1 %1215  ;;  %v1296_v39 = vpop.permute.xlu0 %1295 }
0x17aa   :  { %v1222_v24 = vmul.f32 %v3452_v15, %v1216_v48  ;;  %v30_v48 = vld [vmem:[%s4085_s2 + $0x58] sm:$0xff] }
0x17ab   :  { %v1250_v34 = vmul.f32 1.442695, %v1247_v47  ;;  %v29_v47 = vld [vmem:[%s4085_s2 + $0x50] sm:$0xff] }
0x17ac   :  { %v3264_v14 = vpack.c.bf16 %v30_v48, %v29_v47 }
0x17ad   :  { %3453 = vpow2.f32 %v1250_v34  ;;  %v33_v34 = vld [vmem:[%s4085_s2 + $0x70] sm:$0xff] }
0x17ae   :  { %v1308_v58 = vpop.permute.xlu1 %1307  ;;  %3455 = vpow2.f32 %v1286_v57  ;;  %v3892_v3 = vpack.c.bf16 %v33_v34, %v32_v51 }
0x17af   :  { %v1311_v61 = vsub.f32 %v1308_v58, %v1181_v26  ;;  %3457 = vpow2.f32 %v1212_v60  ;;  %v1769_v60 = vpop.permute.xlu0 %1768 }
0x17b0   :  { %3459 = vpow2.f32 %v1288_v5  ;;  %3290 = vmatpush3.bf16.msra.mxu1 %v3892_v3 }
0x17b1   :  { %v1321_v13 = vmul.f32 %v1318_v62, %v1311_v61  ;;  %3461 = vpow2.f32 %v1324_v63  ;;  %3291 = vmatprep.subr.bf16.mxu1 %v3533_v0 }
0x17b3   :  { %v1323_v2 = vmul.f32 %v1321_v13, %v1311_v61  ;;  %v1254_v10 = vpop.permute.xlu1 %1253  ;;  %v2820_v61 = vld [vmem:[%s4085_s2 + $0x88] ss:$0 sm:$0xff] }
0x17b4   :  { %v1260_v19 = vmul.f32 %v3450_v12, %v1254_v10 }
0x17b5   :  { %v1326_v8 = vmul.f32 1.442695, %v1323_v2 }
0x17b6   :  { %v1262_v32 = vadd.f32 %v1260_v19, %v1222_v24 }
0x17b7   :  { %v1258_v9 = vpop.permute.xlu1 %1257  ;;  %v3454_v17 = vpop.eup %3453  ;;  %3463 = vpow2.f32 %v1326_v8 }
0x17b8   :  { %v3456_v18 = vpop.eup %3455  ;;  %v1261_v7 = vmul.f32 %v3454_v17, %v1258_v9 }
0x17b9   :  { %v3458_v21 = vpop.eup %3457 }
0x17ba   :  { %v3460_v31 = vpop.eup %3459  ;;  %v1223_v16 = vmul.f32 %v3458_v21, %v1220_v6 }
0x17bb   :  { %v3462_v33 = vpop.eup %3461  ;;  %v1299_v23 = vmul.f32 %v3460_v31, %v1296_v39 }
0x17bc   :  { %v1292_v20 = vpop.permute.xlu1 %1291  ;;  %v1263_v36 = vadd.f32 %v1261_v7, %v1223_v16 }
0x17bd   :  { %v1298_v26 = vmul.f32 %v3456_v18, %v1292_v20 }
0x17be   :  { %v1301_v44 = vadd.f32 %v1299_v23, %v1263_v36 }
0x17bf   :  { %v1300_v37 = vadd.f32 %v1298_v26, %v1262_v32 }
0x17c1   :  { %v1330_v35 = vpop.permute.xlu1 %1329  ;;  %v3464_v42 = vpop.eup %3463 }
0x17c2   :  { %v1336_v38 = vmul.f32 %v3462_v33, %v1330_v35 }
0x17c4   :  { %v1338_v41 = vadd.f32 %v1336_v38, %v1300_v37 }
0x17c5   :  { %v1334_v43 = vpop.permute.xlu1 %1333 }
0x17c6   :  { %v1337_v45 = vmul.f32 %v3464_v42, %v1334_v43  ;;  %v1353_v46 = vsel %vm1351_vm12, %v1338_v41, 0.0  ;;  %v1347_v54 = vsel %vm1345_vm15, %v1338_v41, 0.0 }
0x17c7   :  { %3064 = vmatprep.mubr.msk.f32.mxu0 %vm1357_vm13, %v1353_v46 }
0x17c8   :  { %v1339_v49 = vadd.f32 %v1337_v45, %v1301_v44 }
0x17ca   :  { %v1354_v52 = vsel %vm1352_vm14, %v1339_v49, 0.0  ;;  %v1348_v55 = vsel %vm1346_vm0, %v1339_v49, 0.0 }
0x17cb   :  { %3065 = vmatmul.mubr.msk.f32.vlgmr.msra.gmra.mrb[10].mxu0 %vm1357_vm13, %v1354_v52 }
0x17cc   :  { %3263 = vmatpush3.bf16.msk.msra.mxu0 %vm3842_vm11, %v3856_v11  ;;  %3071 = vmatprep.mubr.msk.f32.mxu0 %vm1357_vm13, %v1347_v54  ;;  %v34_v11 = vld [vmem:[%s4085_s2 + $0x78] sm:$0xff] }
0x17cd   :  { %3265 = vmatprep.subr.bf16.mxu0 %v3264_v14  ;;  %v3902_v57 = vpack.c.bf16 %v35_v56, %v34_v11 }
0x17cf   :  { %3293 = vmatpush3.bf16.msra.mxu1 %v3902_v57 }
0x17d0   :  { %3300 = vmatprep.subr.bf16.mxu1 %v3533_v0 }
0x17d3   :  { %3072 = vmatmul.mubr.msk.f32.vlgmr.msra.gmra.mrb[10].mxu0 %vm1357_vm13, %v1348_v55 }
0x17d4   :  { %3267 = vmatpush3.bf16.msra.mxu0 %v3264_v14 }
0x17d5   :  { %3276 = vmatprep.subr.bf16.mxu0 %v3533_v0 }
0x18a6   :  { %v3073_v58 = vpop.f32.mrb[10].mxu0 }
0x18a7   :  { %v1517_v59 = vpop.f32.mrb[11].mxu0 }
0x18a8   :  { %3078 = vmatprep.mubr.msk.f32.mxu0 %vm1526_vm7, %v1517_v59 }
0x18a9   :  { %3079 = vmatmul.mubr.msk.f32.vlgmr.msra.gmra.mrb[12].mxu0 %vm1526_vm7, %v3073_v58 }
0x18aa   :  { %3278 = vmatpush3.bf16.msra.mxu0 %v3892_v3  ;;  %3105 = vmatprep.mubr.msk.f32.mxu0 %vm3534_vm1, %v3535_v4 }
0x18ab   :  { %3279 = vmatprep.subr.bf16.mxu0 %v3533_v0 }
0x18ae   :  { %3281 = vmatpush3.bf16.msra.mxu0 %v3902_v57 }
0x18af   :  { %3282 = vmatprep.subr.bf16.mxu0 %v3533_v0 }
0x18b1   :  { %3106 = vmatmul.mubr.msk.f32.vlgmr.msra.gmra.mrb[14].mxu0 %vm137_vm2, %v1769_v60 }
0x18b2   :  { %3284 = vmatpush3.bf16.msra.mxu0 %v3892_v3  ;;  %3116 = vmatprep.mubr.msk.f32.mxu0 %vm3534_vm1, %v3535_v4 }
0x18b3   :  { %3285 = vmatprep.subr.bf16.mxu0 %v3533_v0 }
0x18b6   :  { %3287 = vmatpush3.bf16.msra.mxu0 %v3902_v57 }
0x18b7   :  { %3294 = vmatprep.subr.bf16.mxu0 %v3533_v0 }
0x197c   :  { %v3080_v62 = vpop.f32.mrb[12].mxu0 }
0x197d   :  { %v3332_v13 = vadd.f32 %v3803_v27, %v3080_v62  ;;  %v1599_v5 = vpop.f32.mrb[13].mxu0 }
0x197e   :  { %v3333_v63 = vadd.f32 %v3806_v29, %v1599_v5 }
0x197f   :  { %v3924_v2 = vadd.f32 %v3332_v13, %v2820_v61 }
0x1980   :  { %v3926_v10 = vadd.f32 %v3333_v63, %v2820_v61 }
0x1984   :  { %v1838_v8 = vpop.f32.mrb[14].mxu0 }
0x1985   :  { %v1842_v9 = vadd.f32 %v1838_v8, %v3926_v10  ;;  %v3107_v12 = vpop.f32.mrb[15].mxu0 }
0x1987   :  { %3465 = vtanh.f32 %v1842_v9  ;;  %v2822_v17 = vmul.f32 -1.442695, %v1842_v9 }
0x1989   :  { %3467 = vpow2.f32 %v2822_v17 }
0x1991   :  { %v3466_v15 = vpop.eup %3465 }
0x1992   :  { %1853 = vrot.lane.b32.xlu1 %v3466_v15, %s3536_s10 }
0x1993   :  { %v3468_v18 = vpop.eup %3467 }
0x1994   :  { %v1846_v19 = vadd.f32 1.0, %v3468_v18 }
0x1996   :  { %3469 = vrcp.f32 %v1846_v19 }
0x19a0   :  { %v3470_v27 = vpop.eup %3469 }
0x19a1   :  { %v1851_v21 = vmul.f32 %v3470_v27, %v1769_v60 }
0x1a04   :  { %v1854_v20 = vpop.permute.xlu1 %1853 }
0x1a05   :  { %v1856_v29 = vmul.f32 %v3470_v27, %v1854_v20 }
0x1a07   :  { %1858 = vrot.lane.b32.xlu0 %v1856_v29, %s3537_s11 }
0x1a79   :  { %v1859_v6 = vpop.permute.xlu0 %1858 }
0x1a7a   :  { %v1861_v24 = vadd.f32 %v1859_v6, %v1851_v21 }
0x1a7c   :  { %3471 = vtanh.f32 %v1861_v24  ;;  %v1957_v41 = vrot.slane %v1861_v24, 6 }
0x1a86   :  { %v3472_v7 = vpop.eup %3471 }
0x1a87   :  { %1864 = vrot.lane.b32.xlu1 %v3472_v7, %s3536_s10 }
0x1af9   :  { %v1865_v26 = vpop.permute.xlu1 %1864 }
0x1afa   :  { %v1867_v28 = vmul.f32 %v3470_v27, %v1865_v26 }
0x1afc   :  { %1869 = vrot.lane.b32.xlu0 %v1867_v28, %s3537_s11 }
0x1b6e   :  { %v1870_v30 = vpop.permute.xlu0 %1869 }
0x1b6f   :  { %1872 = vst.msk [vmem:[#allocation3] sm:$0x3] %vm240_vm3, %v1870_v30  ;;  %3117 = vmatmul.mubr.msk.f32.vlgmr.msra.gmra.mrb[16].mxu0 %vm137_vm2, %v1870_v30 }
0x1b70   :  { %3296 = vmatpush3.bf16.msra.mxu0 %v3892_v3  ;;  %3138 = vmatprep.mubr.msk.f32.mxu0 %vm3534_vm1, %v3535_v4 }
0x1b71   :  { %3297 = vmatprep.subr.bf16.mxu0 %v3533_v0 }
0x1b74   :  { %3299 = vmatpush3.bf16.msra.mxu0 %v3902_v57 }
0x1b75   :  { %3306 = vmatprep.subr.bf16.mxu0 %v3533_v0 }
0x1c42   :  { %v1941_v31 = vpop.f32.mrb[16].mxu0 }
0x1c43   :  { %v1946_v32 = vrot.slane %v1941_v31, 6  ;;  %v3118_v16 = vpop.f32.mrb[17].mxu0 }
0x1c45   :  { %v1948_v33 = vadd.f32 %v1946_v32, %v3926_v10 }
0x1c47   :  { %3473 = vtanh.f32 %v1948_v33  ;;  %v2824_v36 = vmul.f32 -1.442695, %v1948_v33 }
0x1c49   :  { %3475 = vpow2.f32 %v2824_v36 }
0x1c51   :  { %v3474_v35 = vpop.eup %3473 }
0x1c52   :  { %1961 = vrot.lane.b32.xlu1 %v3474_v35, %s3536_s10 }
0x1c53   :  { %v3476_v37 = vpop.eup %3475 }
0x1c54   :  { %v1952_v38 = vadd.f32 1.0, %v3476_v37 }
0x1c56   :  { %3477 = vrcp.f32 %v1952_v38 }
0x1c60   :  { %v3478_v39 = vpop.eup %3477 }
0x1c61   :  { %v1959_v42 = vmul.f32 %v3478_v39, %v1957_v41 }
0x1cc4   :  { %v1962_v40 = vpop.permute.xlu1 %1961 }
0x1cc5   :  { %v1964_v23 = vmul.f32 %v3478_v39, %v1962_v40 }
0x1cc7   :  { %1966 = vrot.lane.b32.xlu0 %v1964_v23, %s3537_s11 }
0x1d39   :  { %v1967_v43 = vpop.permute.xlu0 %1966 }
0x1d3a   :  { %v1969_v44 = vadd.f32 %v1967_v43, %v1959_v42 }
0x1d3c   :  { %3479 = vtanh.f32 %v1969_v44  ;;  %v2068_v61 = vrot.slane %v1969_v44, 6 }
0x1d46   :  { %v3480_v45 = vpop.eup %3479 }
0x1d47   :  { %1972 = vrot.lane.b32.xlu1 %v3480_v45, %s3536_s10 }
0x1db9   :  { %v1973_v46 = vpop.permute.xlu1 %1972 }
0x1dba   :  { %v3945_v47 = vmul.f32 %v3478_v39, %v1973_v46 }
0x1dbc   :  { %v1981_v48 = vrot.slane %v3945_v47, 2 }
0x1dbe   :  { %1982 = vrot.lane.b32.xlu0 %v1981_v48, %s3537_s11 }
0x1e30   :  { %v1983_v49 = vpop.permute.xlu0 %1982 }
0x1e31   :  { %3128 = vmatmul.mubr.msk.f32.vlgmr.msra.gmra.mrb[12].mxu1 %vm137_vm2, %v1983_v49 }
0x1e32   :  { %3302 = vmatpush3.bf16.msra.mxu1 %v3892_v3  ;;  %3149 = vmatprep.mubr.msk.f32.mxu1 %vm3534_vm1, %v3535_v4 }
0x1e33   :  { %3303 = vmatprep.subr.bf16.mxu1 %v3533_v0 }
0x1e36   :  { %3305 = vmatpush3.bf16.msra.mxu1 %v3902_v57 }
0x1e37   :  { %3312 = vmatprep.subr.bf16.mxu1 %v3533_v0 }
0x1f04   :  { %v2052_v14 = vpop.f32.mrb[12].mxu1 }
0x1f05   :  { %v2057_v52 = vrot.slane %v2052_v14, 4  ;;  %v3129_v54 = vpop.f32.mrb[13].mxu1 }
0x1f07   :  { %v2059_v55 = vadd.f32 %v2057_v52, %v3926_v10 }
0x1f09   :  { %3481 = vtanh.f32 %v2059_v55  ;;  %v2826_v34 = vmul.f32 -1.442695, %v2059_v55 }
0x1f0b   :  { %3483 = vpow2.f32 %v2826_v34 }
0x1f13   :  { %v3482_v51 = vpop.eup %3481 }
0x1f14   :  { %2072 = vrot.lane.b32.xlu1 %v3482_v51, %s3536_s10 }
0x1f15   :  { %v3484_v11 = vpop.eup %3483 }
0x1f16   :  { %v2063_v56 = vadd.f32 1.0, %v3484_v11 }
0x1f18   :  { %3485 = vrcp.f32 %v2063_v56 }
0x1f22   :  { %v3486_v58 = vpop.eup %3485 }
0x1f23   :  { %v2070_v62 = vmul.f32 %v3486_v58, %v2068_v61 }
0x1f86   :  { %v2073_v59 = vpop.permute.xlu1 %2072 }
0x1f87   :  { %v2075_v60 = vmul.f32 %v3486_v58, %v2073_v59 }
0x1f89   :  { %2077 = vrot.lane.b32.xlu0 %v2075_v60, %s3537_s11 }
0x1ffb   :  { %v2078_v13 = vpop.permute.xlu0 %2077 }
0x1ffc   :  { %v2080_v5 = vadd.f32 %v2078_v13, %v2070_v62 }
0x1ffe   :  { %3487 = vtanh.f32 %v2080_v5  ;;  %v2179_v28 = vrot.slane %v2080_v5, 6 }
0x2008   :  { %v3488_v63 = vpop.eup %3487 }
0x2009   :  { %2083 = vrot.lane.b32.xlu1 %v3488_v63, %s3536_s10 }
0x207b   :  { %v2084_v8 = vpop.permute.xlu1 %2083 }
0x207c   :  { %v3960_v9 = vmul.f32 %v3486_v58, %v2084_v8 }
0x207e   :  { %v2092_v12 = vrot.slane %v3960_v9, 4 }
0x2080   :  { %2093 = vrot.lane.b32.xlu0 %v2092_v12, %s3537_s11 }
0x20f2   :  { %v2094_v15 = vpop.permute.xlu0 %2093 }
0x20f3   :  { %3139 = vmatmul.mubr.msk.f32.vlgmr.msra.gmra.mrb[18].mxu0 %vm137_vm2, %v2094_v15 }
0x20f4   :  { %3308 = vmatpush3.bf16.msra.mxu0 %v3892_v3  ;;  %3160 = vmatprep.mubr.msk.f32.mxu0 %vm3534_vm1, %v3535_v4 }
0x20f5   :  { %3309 = vmatprep.subr.bf16.mxu0 %v3533_v0 }
0x20f8   :  { %3311 = vmatpush3.bf16.msra.mxu0 %v3902_v57 }
0x20f9   :  { %3318 = vmatprep.subr.bf16.mxu0 %v3533_v0 }
0x21c6   :  { %v2163_v17 = vpop.f32.mrb[18].mxu0 }
0x21c7   :  { %v2168_v18 = vrot.slane %v2163_v17, 2  ;;  %v3140_v19 = vpop.f32.mrb[19].mxu0 }
0x21c9   :  { %v2170_v27 = vadd.f32 %v2168_v18, %v3926_v10 }
0x21cb   :  { %3489 = vtanh.f32 %v2170_v27  ;;  %v2828_v29 = vmul.f32 -1.442695, %v2170_v27 }
0x21cd   :  { %3491 = vpow2.f32 %v2828_v29 }
0x21d5   :  { %v3490_v20 = vpop.eup %3489 }
0x21d6   :  { %2183 = vrot.lane.b32.xlu1 %v3490_v20, %s3536_s10 }
0x21d7   :  { %v3492_v21 = vpop.eup %3491 }
0x21d8   :  { %v2174_v6 = vadd.f32 1.0, %v3492_v21 }
0x21da   :  { %3493 = vrcp.f32 %v2174_v6 }
0x21e4   :  { %v3494_v24 = vpop.eup %3493 }
0x21e5   :  { %v2181_v30 = vmul.f32 %v3494_v24, %v2179_v28 }
0x2248   :  { %v2184_v7 = vpop.permute.xlu1 %2183 }
0x2249   :  { %v2186_v26 = vmul.f32 %v3494_v24, %v2184_v7 }
0x224b   :  { %2188 = vrot.lane.b32.xlu0 %v2186_v26, %s3537_s11 }
0x22bd   :  { %v2189_v31 = vpop.permute.xlu0 %2188 }
0x22be   :  { %v2191_v32 = vadd.f32 %v2189_v31, %v2181_v30 }
0x22c0   :  { %3495 = vtanh.f32 %v2191_v32  ;;  %v2287_v46 = vrot.slane %v2191_v32, 6 }
0x22ca   :  { %v3496_v10 = vpop.eup %3495 }
0x22cb   :  { %2194 = vrot.lane.b32.xlu1 %v3496_v10, %s3536_s10 }
0x233d   :  { %v2195_v16 = vpop.permute.xlu1 %2194 }
0x233e   :  { %v3975_v33 = vmul.f32 %v3494_v24, %v2195_v16 }
0x2340   :  { %v2203_v35 = vrot.slane %v3975_v33, 6 }
0x2342   :  { %2204 = vrot.lane.b32.xlu0 %v2203_v35, %s3537_s11 }
0x23b4   :  { %v2205_v36 = vpop.permute.xlu0 %2204 }
0x23b5   :  { %3150 = vmatmul.mubr.msk.f32.vlgmr.msra.gmra.mrb[14].mxu1 %vm137_vm2, %v2205_v36 }
0x23b6   :  { %3314 = vmatpush3.bf16.msra.mxu1 %v3892_v3  ;;  %3171 = vmatprep.mubr.msk.f32.mxu1 %vm3534_vm1, %v3535_v4 }
0x23b7   :  { %3315 = vmatprep.subr.bf16.mxu1 %v3533_v0 }
0x23ba   :  { %3317 = vmatpush3.bf16.msra.mxu1 %v3902_v57 }
0x2488   :  { %v2274_v37 = vpop.f32.mrb[14].mxu1 }
0x2489   :  { %v2278_v38 = vadd.f32 %v2274_v37, %v3924_v2  ;;  %v3151_v39 = vpop.f32.mrb[15].mxu1 }
0x248b   :  { %3497 = vtanh.f32 %v2278_v38  ;;  %v2830_v23 = vmul.f32 -1.442695, %v2278_v38 }
0x248d   :  { %3499 = vpow2.f32 %v2830_v23 }
0x2495   :  { %v3498_v40 = vpop.eup %3497 }
0x2496   :  { %2291 = vrot.lane.b32.xlu1 %v3498_v40, %s3536_s10 }
0x2497   :  { %v3500_v41 = vpop.eup %3499 }
0x2498   :  { %v2282_v42 = vadd.f32 1.0, %v3500_v41 }
0x249a   :  { %3501 = vrcp.f32 %v2282_v42 }
0x24a4   :  { %v3502_v43 = vpop.eup %3501 }
0x24a5   :  { %v2289_v48 = vmul.f32 %v3502_v43, %v2287_v46 }
0x2508   :  { %v2292_v44 = vpop.permute.xlu1 %2291 }
0x2509   :  { %v2294_v45 = vmul.f32 %v3502_v43, %v2292_v44 }
0x250b   :  { %2296 = vrot.lane.b32.xlu0 %v2294_v45, %s3537_s11 }
0x257d   :  { %v2297_v49 = vpop.permute.xlu0 %2296 }
0x257e   :  { %v2299_v14 = vadd.f32 %v2297_v49, %v2289_v48 }
0x2580   :  { %3503 = vtanh.f32 %v2299_v14 }
0x258a   :  { %v3504_v52 = vpop.eup %3503 }
0x258b   :  { %2302 = vrot.lane.b32.xlu1 %v3504_v52, %s3536_s10 }
0x25fd   :  { %v2303_v54 = vpop.permute.xlu1 %2302 }
0x25fe   :  { %v2305_v55 = vmul.f32 %v3502_v43, %v2303_v54  ;;  %v3551_v54 = vmov 1983009808  }
0x2600   :  { %2307 = vrot.lane.b32.xlu0 %v2305_v55, %s3537_s11  ;;  %v1015_v55 = vunpack.c.l.s4 %v3551_v54 }
0x2672   :  { %v2308_v51 = vpop.permute.xlu0 %2307 }
0x2673   :  { %2310 = vst.msk [vmem:[#allocation3 + $0x8] sm:$0x3] %vm240_vm3, %v2308_v51  ;;  %3161 = vmatmul.mubr.msk.f32.vlgmr.msra.gmra.mrb[20].mxu0 %vm137_vm2, %v2308_v51  ;;  %v1013_v51 = vcombine.high %v3769_v1, %v3769_v1 }
0x2674   :  { %3320 = vmatpush3.bf16.msra.mxu0 %v3892_v3  ;;  %3182 = vmatprep.mubr.msk.f32.mxu0 %vm3534_vm1, %v3535_v4  ;;  %vm1037_vm1 = vcmask 517376  }
0x2675   :  { %3321 = vmatprep.subr.bf16.mxu0 %v3533_v0  ;;  %v2395_v0 = vrot.slane %v2299_v14, 6 }
0x2678   :  { %3323 = vmatpush3.bf16.msra.mxu0 %v3902_v57 }
0x2746   :  { %v2379_v34 = vpop.f32.mrb[20].mxu0 }
0x2747   :  { %v2384_v11 = vrot.slane %v2379_v34, 6  ;;  %v3162_v56 = vpop.f32.mrb[21].mxu0 }
0x2749   :  { %v2386_v58 = vadd.f32 %v2384_v11, %v3924_v2 }
0x274b   :  { %3505 = vtanh.f32 %v2386_v58  ;;  %v2832_v60 = vmul.f32 -1.442695, %v2386_v58 }
0x274d   :  { %3507 = vpow2.f32 %v2832_v60 }
0x2755   :  { %v3506_v59 = vpop.eup %3505 }
0x2756   :  { %2399 = vrot.lane.b32.xlu1 %v3506_v59, %s3536_s10 }
0x2757   :  { %v3508_v61 = vpop.eup %3507 }
0x2758   :  { %v2390_v3 = vadd.f32 1.0, %v3508_v61 }
0x275a   :  { %3509 = vrcp.f32 %v2390_v3 }
0x2764   :  { %v3510_v62 = vpop.eup %3509 }
0x2765   :  { %v2397_v57 = vmul.f32 %v3510_v62, %v2395_v0 }
0x27c8   :  { %v2400_v13 = vpop.permute.xlu1 %2399 }
0x27c9   :  { %v2402_v5 = vmul.f32 %v3510_v62, %v2400_v13 }
0x27cb   :  { %2404 = vrot.lane.b32.xlu0 %v2402_v5, %s3537_s11 }
0x283d   :  { %v2405_v63 = vpop.permute.xlu0 %2404 }
0x283e   :  { %v2407_v8 = vadd.f32 %v2405_v63, %v2397_v57  ;;  %v43_v63 = vld [vmem:[%s4085_s2 + $0xc0] sm:$0xff] }
0x2840   :  { %3511 = vtanh.f32 %v2407_v8  ;;  %v2506_v32 = vrot.slane %v2407_v8, 6 }
0x284a   :  { %v3512_v12 = vpop.eup %3511 }
0x284b   :  { %2410 = vrot.lane.b32.xlu1 %v3512_v12, %s3536_s10  ;;  %v45_v12 = vld [vmem:[%s4085_s2 + $0xd0] sm:$0xff] }
0x28bd   :  { %v2411_v15 = vpop.permute.xlu1 %2410 }
0x28be   :  { %v4001_v17 = vmul.f32 %v3510_v62, %v2411_v15 }
0x28c0   :  { %v2419_v18 = vrot.slane %v4001_v17, 2 }
0x28c2   :  { %2420 = vrot.lane.b32.xlu0 %v2419_v18, %s3537_s11 }
0x2934   :  { %v2421_v19 = vpop.permute.xlu0 %2420 }
0x2935   :  { %3172 = vmatmul.mubr.msk.f32.vlgmr.msra.gmra.mrb[16].mxu1 %vm137_vm2, %v2421_v19 }
0x2a08   :  { %v2490_v27 = vpop.f32.mrb[16].mxu1 }
0x2a09   :  { %v2495_v20 = vrot.slane %v2490_v27, 4  ;;  %v3173_v29 = vpop.f32.mrb[17].mxu1 }
0x2a0b   :  { %v2497_v21 = vadd.f32 %v2495_v20, %v3924_v2 }
0x2a0d   :  { %3513 = vtanh.f32 %v2497_v21  ;;  %v2834_v24 = vmul.f32 -1.442695, %v2497_v21 }
0x2a0f   :  { %3515 = vpow2.f32 %v2834_v24 }
0x2a17   :  { %v3514_v6 = vpop.eup %3513 }
0x2a18   :  { %2510 = vrot.lane.b32.xlu1 %v3514_v6, %s3536_s10 }
0x2a19   :  { %v3516_v7 = vpop.eup %3515 }
0x2a1a   :  { %v2501_v26 = vadd.f32 1.0, %v3516_v7 }
0x2a1c   :  { %3517 = vrcp.f32 %v2501_v26 }
0x2a26   :  { %v3518_v28 = vpop.eup %3517 }
0x2a27   :  { %v2508_v10 = vmul.f32 %v3518_v28, %v2506_v32 }
0x2a8a   :  { %v2511_v30 = vpop.permute.xlu1 %2510 }
0x2a8b   :  { %v2513_v31 = vmul.f32 %v3518_v28, %v2511_v30 }
0x2a8d   :  { %2515 = vrot.lane.b32.xlu0 %v2513_v31, %s3537_s11  ;;  %v2837_v31 = vld [vmem:[%s4085_s2 + $0xd8] ss:$0 sm:$0xff] }
0x2aff   :  { %v2516_v16 = vpop.permute.xlu0 %2515 }
0x2b00   :  { %v2518_v35 = vadd.f32 %v2516_v16, %v2508_v10 }
0x2b02   :  { %3519 = vtanh.f32 %v2518_v35  ;;  %v2617_v58 = vrot.slane %v2518_v35, 6 }
0x2b0c   :  { %v3520_v36 = vpop.eup %3519 }
0x2b0d   :  { %2521 = vrot.lane.b32.xlu1 %v3520_v36, %s3536_s10 }
0x2b7f   :  { %v2522_v37 = vpop.permute.xlu1 %2521 }
0x2b80   :  { %v2524_v38 = vmul.f32 %v3518_v28, %v2522_v37 }
0x2b82   :  { %v2530_v39 = vrot.slane %v2524_v38, 4 }
0x2b84   :  { %2531 = vrot.lane.b32.xlu0 %v2530_v39, %s3537_s11 }
0x2bf6   :  { %v2532_v40 = vpop.permute.xlu0 %2531 }
0x2bf7   :  { %3183 = vmatmul.mubr.msk.f32.vlgmr.msra.gmra.mrb[22].mxu0 %vm137_vm2, %v2532_v40 }
0x2cca   :  { %v2601_v23 = vpop.f32.mrb[22].mxu0 }
0x2ccb   :  { %v2606_v41 = vrot.slane %v2601_v23, 2  ;;  %v3184_v42 = vpop.f32.mrb[23].mxu0 }
0x2ccd   :  { %v2608_v43 = vadd.f32 %v2606_v41, %v3924_v2  ;;  %v1016_v2 = vunpack.c.0.s8 %v1015_v55 }
0x2ccf   :  { %3521 = vtanh.f32 %v2608_v43  ;;  %v2836_v45 = vmul.f32 -1.442695, %v2608_v43  ;;  %v1019_v34 = vsub.s32 %v1016_v2, %v3868_v22 }
0x2cd1   :  { %3523 = vpow2.f32 %v2836_v45  ;;  %v1020_v11 = vrot.slane %v1013_v51, %v1019_v34  ;;  %v2676_v6 = vrot.slane %v3820_v50, %v1019_v34 }
0x2cd3   :  { %v1021_v56 = vcombine.high %v1020_v11, %v1020_v11 }
0x2cd9   :  { %v3522_v44 = vpop.eup %3521 }
0x2cda   :  { %2621 = vrot.lane.b32.xlu1 %v3522_v44, %s3536_s10 }
0x2cdb   :  { %v3524_v46 = vpop.eup %3523 }
0x2cdc   :  { %v2612_v48 = vadd.f32 1.0, %v3524_v46 }
0x2cde   :  { %3525 = vrcp.f32 %v2612_v48 }
0x2ce8   :  { %v3526_v49 = vpop.eup %3525 }
0x2ce9   :  { %v2619_v4 = vmul.f32 %v3526_v49, %v2617_v58 }
0x2d4c   :  { %v2622_v14 = vpop.permute.xlu1 %2621 }
0x2d4d   :  { %v2624_v52 = vmul.f32 %v3526_v49, %v2622_v14 }
0x2d4f   :  { %2626 = vrot.lane.b32.xlu0 %v2624_v52, %s3537_s11 }
0x2d53   :  { %1977 = vrot.lane.b32.xlu0 %v3945_v47, %s3537_s11 }
0x2d57   :  { %2199 = vrot.lane.b32.xlu0 %v3975_v33, %s3537_s11  ;;  %v1027_v33 = vcombine.high %v3740_v53, %v3740_v53  ;;  %v42_v53 = vld [vmem:[%s4085_s2 + $0xb8] sm:$0xff] }
0x2d58   :  { %v3324_v8 = vpack.c.bf16 %v43_v63, %v42_v53 }
0x2d59   :  { %v1034_v62 = vrot.slane %v1027_v33, %v1019_v34 }
0x2d5a   :  { %3325 = vmatprep.subr.bf16.mxu1 %v3324_v8 }
0x2d5b   :  { %2526 = vrot.lane.b32.xlu0 %v2524_v38, %s3537_s11  ;;  %v1035_v0 = vcombine.high %v1034_v62, %v1034_v62  ;;  %3327 = vmatpush3.bf16.msra.mxu1 %v3324_v8 }
0x2d5f   :  { %1022 = vrot.lane.b32.xlu0 %v1021_v56, %s3537_s11 }
0x2dc1   :  { %v2627_v59 = vpop.permute.xlu0 %2626 }
0x2dc2   :  { %v2629_v60 = vadd.f32 %v2627_v59, %v2619_v4 }
0x2dc4   :  { %3527 = vtanh.f32 %v2629_v60  ;;  %v2656_v47 = vcombine.high %v2629_v60, %v2629_v60 }
0x2dc5   :  { %v1978_v61 = vpop.permute.xlu0 %1977 }
0x2dc6   :  { %1980 = vst.msk [vmem:[#allocation3] sm:$0xc] %vm349_vm4, %v1978_v61  ;;  %v2663_v1 = vrot.slane %v2656_v47, %v1019_v34 }
0x2dc8   :  { %v2664_v22 = vcombine.high %v2663_v1, %v2663_v1 }
0x2dc9   :  { %v2200_v3 = vpop.permute.xlu0 %2199 }
0x2dca   :  { %2202 = vst.msk [vmem:[#allocation3] sm:$0xc0] %vm573_vm5, %v2200_v3  ;;  %2665 = vrot.lane.b32.xlu0 %v2664_v22, %s3536_s10 }
0x2dcd   :  { %v2527_v13 = vpop.permute.xlu0 %2526 }
0x2dce   :  { %v3528_v5 = vpop.eup %3527  ;;  %2529 = vst.msk [vmem:[#allocation3 + $0x8] sm:$0x30] %vm461_vm6, %v2527_v13 }
0x2dcf   :  { %2632 = vrot.lane.b32.xlu1 %v3528_v5, %s3536_s10 }
0x2dd1   :  { %v1023_v57 = vpop.permute.xlu0 %1022 }
0x2dd2   :  { %1025 = vst.msk [vmem:[%s4089_s5] sm:$0x3] %vm240_vm3, %v1023_v57  ;;  %vm2653_vm3 = vcmask 779776  }
0x2dd3   :  { %2088 = vrot.lane.b32.xlu1 %v3960_v9, %s3537_s11  ;;  %1038 = vst.msk [vmem:[%s4089_s5] sm:$0x3] %vm1037_vm1, %v1035_v0  ;;  %v44_v9 = vld [vmem:[%s4085_s2 + $0xc8] sm:$0xff] }
0x2dd4   :  { %v3328_v15 = vpack.c.bf16 %v45_v12, %v44_v9 }
0x2dd6   :  { %3329 = vmatprep.subr.bf16.mxu1 %v3328_v15 }
0x2dd7   :  { %2415 = vrot.lane.b32.xlu1 %v4001_v17, %s3537_s11  ;;  %3331 = vmatpush3.bf16.msra.mxu1 %v3328_v15 }
0x2e3c   :  { %v2666_v28 = vpop.permute.xlu0 %2665 }
0x2e41   :  { %v2633_v17 = vpop.permute.xlu1 %2632 }
0x2e42   :  { %v2635_v18 = vmul.f32 %v3526_v49, %v2633_v17 }
0x2e44   :  { %v2641_v19 = vcombine.high %v2635_v18, %v2635_v18  ;;  %2637 = vrot.lane.b32.xlu1 %v2635_v18, %s3537_s11 }
0x2e45   :  { %v2089_v27 = vpop.permute.xlu1 %2088 }
0x2e46   :  { %v2648_v20 = vrot.slane %v2641_v19, %v1019_v34  ;;  %2091 = vst.msk [vmem:[#allocation3] sm:$0x30] %vm461_vm6, %v2089_v27  ;;  %vm2770_vm6 = vcmp.lt.s32.totalorder %v3865_v25, 20 }
0x2e48   :  { %v2649_v29 = vcombine.high %v2648_v20, %v2648_v20 }
0x2e49   :  { %v2416_v21 = vpop.permute.xlu1 %2415 }
0x2e4a   :  { %2418 = vst.msk [vmem:[#allocation3 + $0x8] sm:$0xc] %vm349_vm4, %v2416_v21  ;;  %2650 = vrot.lane.b32.xlu1 %v2649_v29, %s3552_s3  ;;  %vm2680_vm4 = vcmask 25600  }
0x2e4d   :  { %v2682_v24 = vld [vmem:[#allocation3] sm:$0xff] }
0x2e4e   :  { %2677 = vrot.lane.b32.xlu1 %v2676_v6, %s3553_s18  ;;  %3193 = vmatprep.mubr.msk.f32.mxu1 %vm137_vm2, %v2682_v24 }
0x2eb6   :  { %v2638_v7 = vpop.permute.xlu1 %2637 }
0x2eb7   :  { %2640 = vst.msk [vmem:[#allocation3 + $0x8] sm:$0xc0] %vm573_vm5, %v2638_v7  ;;  %vm2769_vm5 = vcmp.ge.s32.totalorder %v3865_v25, 16 }
0x2ebc   :  { %v2651_v26 = vpop.permute.xlu1 %2650 }
0x2ebd   :  { %2654 = vst.msk [vmem:[%s4089_s5] sm:$0x3] %vm2653_vm3, %v2651_v26 }
0x2ebe   :  { %2669 = vst.msk [vmem:[%s4089_s5] sm:$0x3] %vm2668_vm8, %v2666_v28  ;;  %v2683_v50 = vld [vmem:[#allocation3 + $0x8] sm:$0xff] }
0x2ebf   :  { %3194 = vmatmul.mubr.msk.f32.vlgmr.msra.gmra.mrb[18].mxu1 %vm137_vm2, %v2683_v50  ;;  %vm2771_vm2 = vmand %vm2769_vm5, %vm2770_vm6 }
0x2ec0   :  { %v2678_v30 = vpop.permute.xlu1 %2677 }
0x2ec1   :  { %2681 = vst.msk [vmem:[%s4089_s5 + $0x2] sm:$0x3] %vm2680_vm4, %v2678_v30 }
0x2f92   :  { %v3195_v32 = vpop.f32.mrb[18].mxu1 }
0x2f93   :  { %v2766_v10 = vadd.f32 %v3195_v32, %v2837_v31  ;;  %v2760_v16 = vpop.f32.mrb[19].mxu1 }
0x2f94   :  { %v2761_v35 = vadd.f32 %v2837_v31, %v2760_v16 }
0x2f95   :  { %3529 = vtanh.f32 %v2766_v10 }
0x2f96   :  { %3531 = vtanh.f32 %v2761_v35 }
0x2f9f   :  { %v3530_v36 = vpop.eup %3529 }
0x2fa0   :  { %v3532_v37 = vpop.eup %3531  ;;  %v2775_v38 = vsel %vm2771_vm2, %v3530_v36, %v2766_v10 }
0x2fa1   :  { %2777 = vst [vmem:[%s4090_s4 + $0x8] sm:$0xff] %v2775_v38  ;;  %v2774_v39 = vsel %vm2771_vm2, %v3532_v37, %v2761_v35 }
0x2fa2   :  { %2776 = vst [vmem:[%s4090_s4] sm:$0xff] %v2774_v39 }

</bundles_post_ra>
